<compile_context>
chip_gen: v6e
topology: v6e:2x2x1
jax: 0.10.0
libtpu: 0.0.40
codegen_flags: <defaults>
</compile_context>

<pallas_src>
import math
import functools

import jax
import jax.numpy as jnp
import numpy as np
from jax.experimental import pallas as pl
from jax.experimental.pallas import tpu as pltpu


# ----------------------------------------------------------------------------
# Fused kernel: projection+PE -> L x encoder layer -> last-token head
# grid = (batch_tiles, num_layers); activation slab stays resident in VMEM
# scratch across the layer axis.
# ----------------------------------------------------------------------------
def _make_fused_kernel(Bt, S, D, H):
    hd = D // H
    scale = 1.0 / math.sqrt(hd)
    eps = 1e-5
    M = Bt * S  # batch flattened into the matmul M dimension

    def layernorm(y, g, b):
        # two-pass statistics (better numerical fidelity vs torch reference)
        mu = jnp.mean(y, axis=-1, keepdims=True)
        yc = y - mu
        var = jnp.mean(yc * yc, axis=-1, keepdims=True)
        return yc * jax.lax.rsqrt(var + eps) * g + b

    def kernel(x_ref, pw_ref, pb_ref, pe_ref, hm_ref,
               wqkv_ref, bqkv_ref, wo_ref, bo_ref,
               g1_ref, be1_ref, w1_ref, fb1_ref, w2_ref, fb2_ref,
               g2_ref, be2_ref, ow_ref, ob_ref,
               o_ref, h_ref):
        l = pl.program_id(1)  # layer index (inner, "arbitrary" axis)

        # ---- first layer step: input projection + positional encoding ------
        @pl.when(l == 0)
        def _():
            x = x_ref[...].reshape(M, -1).astype(jnp.bfloat16)        # (M, I)
            h0 = jnp.dot(x, pw_ref[...], preferred_element_type=jnp.float32)
            h0 = h0 + pb_ref[...]                                     # (M, D)
            h0 = h0.reshape(Bt, S, D) + pe_ref[...]                   # + PE
            h_ref[...] = h0.reshape(M, D)

        # ---- one post-LN encoder layer (every grid step) --------------------
        h = h_ref[...]                                                # (M, D) f32

        # QKV projection on the flattened (M, D) slab
        qkv = jnp.dot(h.astype(jnp.bfloat16), wqkv_ref[0],
                      preferred_element_type=jnp.float32) + bqkv_ref[0]  # (M, 3D)
        q = qkv[:, :D].reshape(Bt, S, D)
        k = qkv[:, D:2 * D].reshape(Bt, S, D)
        v = qkv[:, 2 * D:].reshape(Bt, S, D)

        hm = hm_ref[...]                          # (H, D) f32 one-hot partition
        hm_b = hm.astype(jnp.bfloat16)

        # Per-head scores via a Q-side channel mask only; K/V stay unmasked.
        # Heads are folded into the matmul M dim -> batch dim is just Bt.
        qh = q.astype(jnp.bfloat16)[:, None, :, :] * hm_b[None, :, None, :]
        qh = qh.reshape(Bt, H * S, D)
        kb = k.astype(jnp.bfloat16)
        vb = v.astype(jnp.bfloat16)

        s = jax.lax.dot_general(qh, kb, (((2,), (2,)), ((0,), (0,))),
                                preferred_element_type=jnp.float32) * scale
        s = s - jnp.max(s, axis=-1, keepdims=True)                    # (Bt,HS,S)
        p = jnp.exp(s)
        p = p * pl.reciprocal(jnp.sum(p, axis=-1, keepdims=True), approx=True)

        ctx = jax.lax.dot_general(p.astype(jnp.bfloat16), vb,
                                  (((2,), (1,)), ((0,), (0,))),
                                  preferred_element_type=jnp.float32)  # (Bt,HS,D)
        # Each channel keeps only its own head's context, then collapse heads.
        ctx = ctx.reshape(Bt, H, S, D) * hm[None, :, None, :]
        attn = jnp.sum(ctx, axis=1).reshape(M, D)                      # (M, D)
        attn = jnp.dot(attn.astype(jnp.bfloat16), wo_ref[0],
                       preferred_element_type=jnp.float32) + bo_ref[0]

        # residual + LayerNorm 1
        y = layernorm(h + attn, g1_ref[0], be1_ref[0])

        # feed-forward (ReLU)
        f = jnp.dot(y.astype(jnp.bfloat16), w1_ref[0],
                    preferred_element_type=jnp.float32) + fb1_ref[0]
        f = jnp.maximum(f, 0.0)
        f = jnp.dot(f.astype(jnp.bfloat16), w2_ref[0],
                    preferred_element_type=jnp.float32) + fb2_ref[0]

        # residual + LayerNorm 2
        z = layernorm(y + f, g2_ref[0], be2_ref[0])
        h_ref[...] = z

        # ---- last layer step: last token -> output Linear (lane-dense) ------
        @pl.when(l == pl.num_programs(1) - 1)
        def _():
            zz = h_ref[...].reshape(Bt, S, D)
            last = zz[:, S - 1, :]                                    # (Bt, D)
            out = jnp.dot(last.astype(jnp.bfloat16), ow_ref[...],
                          preferred_element_type=jnp.float32) + ob_ref[...]
            o_ref[...] = out.reshape(Bt, 1, -1)

    return kernel


# ----------------------------------------------------------------------------
# Wrapper: single fused pallas_call
# ----------------------------------------------------------------------------
@functools.partial(jax.jit, static_argnames=("nhead", "batch_tile"))
def transformer_forward(x, params, pe, head_mask, *, nhead, batch_tile=None):
    B, S, I = x.shape
    D = pe.shape[1]
    L = params["wqkv"].shape[0]
    O = params["out_w"].shape[1]

    # Perf: default to the WHOLE batch in one tile -> largest matmul M dim,
    # layer weights streamed exactly once, no redundant per-tile weight DMA.
    Bt = B if batch_tile is None else batch_tile
    assert B % Bt == 0
    nbt = B // Bt

    # Lane-dense output head: pad output_dim up to a multiple of 128 and slice
    # back in the wrapper (avoids masked vst partial stores).
    Opad = max(128, ((O + 127) // 128) * 128)
    out_w = jnp.zeros((D, Opad), params["out_w"].dtype).at[:, :O].set(params["out_w"])
    out_b = jnp.zeros((1, Opad), params["out_b"].dtype).at[:, :O].set(params["out_b"])

    kernel = _make_fused_kernel(Bt, S, D, nhead)

    def const_spec(a):
        n = a.ndim
        return pl.BlockSpec(a.shape, lambda bt, l, _n=n: (0,) * _n)

    def layer_spec(a):
        blk = (1,) + a.shape[1:]
        nz = a.ndim - 1
        return pl.BlockSpec(blk, lambda bt, l, _nz=nz: (l,) + (0,) * _nz)

    layer_arrays = [
        params["wqkv"], params["bqkv"], params["wo"], params["bo"],
        params["ln1_g"], params["ln1_b"],
        params["w1"], params["b1"], params["w2"], params["b2"],
        params["ln2_g"], params["ln2_b"],
    ]

    in_arrays = ([x, params["proj_w"], params["proj_b"], pe, head_mask]
                 + layer_arrays
                 + [out_w, out_b])

    in_specs = (
        [pl.BlockSpec((Bt, S, I), lambda bt, l: (bt, 0, 0))]
        + [const_spec(a) for a in
           [params["proj_w"], params["proj_b"], pe, head_mask]]
        + [layer_spec(a) for a in layer_arrays]
        + [const_spec(out_w), const_spec(out_b)]
    )

    out = pl.pallas_call(
        kernel,
        out_shape=jax.ShapeDtypeStruct((B, 1, Opad), jnp.float32),
        grid=(nbt, L),
        in_specs=in_specs,
        out_specs=pl.BlockSpec((Bt, 1, Opad), lambda bt, l: (bt, 0, 0)),
        scratch_shapes=[pltpu.VMEM((Bt * S, D), jnp.float32)],
        compiler_params=pltpu.CompilerParams(
            dimension_semantics=("parallel", "arbitrary"),
            # explicit VMEM budget; <= physical on v5e/v6e (128 MiB) & v7x (64 MiB)
            vmem_limit_bytes=64 * 1024 * 1024),
    )(*in_arrays)
    return out.reshape(B, Opad)[:, :O]


# ----------------------------------------------------------------------------
# Parameter / constant construction (deterministic, synthetic)
# ----------------------------------------------------------------------------
def init_params(key, input_dim, d_model, nhead, num_layers, dim_ff, output_dim):
    def nrm(k, shape, scale=0.05, dtype=jnp.float32):
        return (scale * jax.random.normal(k, shape, dtype=jnp.float32)).astype(dtype)

    L, D, F = num_layers, d_model, dim_ff
    keys = jax.random.split(key, 12)
    return {
        # matmul weights stored in bf16 (MXU operands); biases / LN params f32
        "proj_w": nrm(keys[0], (input_dim, D), dtype=jnp.bfloat16),
        "proj_b": nrm(keys[1], (1, D)),
        "out_w": nrm(keys[2], (D, output_dim), dtype=jnp.bfloat16),
        "out_b": nrm(keys[3], (1, output_dim)),
        "wqkv": nrm(keys[4], (L, D, 3 * D), dtype=jnp.bfloat16),
        "bqkv": nrm(keys[5], (L, 1, 3 * D)),
        "wo": nrm(keys[6], (L, D, D), dtype=jnp.bfloat16),
        "bo": nrm(keys[7], (L, 1, D)),
        "ln1_g": jnp.ones((L, 1, D), jnp.float32),
        "ln1_b": jnp.zeros((L, 1, D), jnp.float32),
        "w1": nrm(keys[8], (L, D, F), dtype=jnp.bfloat16),
        "b1": nrm(keys[9], (L, 1, F)),
        "w2": nrm(keys[10], (L, F, D), dtype=jnp.bfloat16),
        "b2": nrm(keys[11], (L, 1, D)),
        "ln2_g": jnp.ones((L, 1, D), jnp.float32),
        "ln2_b": jnp.zeros((L, 1, D), jnp.float32),
    }


def make_positional_encoding(seq_len, d_model):
    position = np.arange(seq_len)[:, None].astype(np.float32)
    div_term = np.exp(np.arange(0, d_model, 2).astype(np.float32)
                      * (-np.log(10000.0) / d_model))
    pe = np.zeros((seq_len, d_model), dtype=np.float32)
    pe[:, 0::2] = np.sin(position * div_term)
    pe[:, 1::2] = np.cos(position * div_term)
    return jnp.asarray(pe)


def make_head_mask(nhead, d_model):
    hd = d_model // nhead
    m = np.zeros((nhead, d_model), dtype=np.float32)
    for h in range(nhead):
        m[h, h * hd:(h + 1) * hd] = 1.0
    return jnp.asarray(m)


if __name__ == "__main__":
    # Small shapes consistent with the module's forward
    # (d_model kept at 128 so all tiles are lane-dense; hd = 32 < 128 so the
    #  head-mask attention trick is the right regime).
    batch = 4
    seq_len = 8
    input_dim = 8
    d_model = 128
    nhead = 4
    num_encoder_layers = 2
    dim_feedforward = 256
    output_dim = 2

    root = jax.random.PRNGKey(0)
    k_x, k_p = jax.random.split(root)

    x = jax.random.normal(k_x, (batch, seq_len, input_dim), dtype=jnp.float32)
    params = init_params(k_p, input_dim, d_model, nhead,
                         num_encoder_layers, dim_feedforward, output_dim)
    pe = make_positional_encoding(seq_len, d_model)
    head_mask = make_head_mask(nhead, d_model)

    # batch_tile defaults to the full batch (nbt = 1): largest MXU M dim,
    # single pass over the weight stack.
    out = transformer_forward(x, params, pe, head_mask, nhead=nhead)
    out = jax.block_until_ready(out)

    assert out.shape == (batch, output_dim), out.shape
    assert jnp.all(jnp.isfinite(out))
    print("KERNEL_OK")
</pallas_src>

<mosaic_0001>
module attributes {stable_mosaic.version = 11 : i64} {
  func.func @kernel(%arg0: i32, %arg1: i32, %arg2: memref<4x8x8xf32, #tpu.memory_space<vmem>>, %arg3: memref<8x128xbf16, #tpu.memory_space<vmem>>, %arg4: memref<1x128xf32, #tpu.memory_space<vmem>>, %arg5: memref<8x128xf32, #tpu.memory_space<vmem>>, %arg6: memref<4x128xf32, #tpu.memory_space<vmem>>, %arg7: memref<1x128x384xbf16, #tpu.memory_space<vmem>>, %arg8: memref<1x1x384xf32, #tpu.memory_space<vmem>>, %arg9: memref<1x128x128xbf16, #tpu.memory_space<vmem>>, %arg10: memref<1x1x128xf32, #tpu.memory_space<vmem>>, %arg11: memref<1x1x128xf32, #tpu.memory_space<vmem>>, %arg12: memref<1x1x128xf32, #tpu.memory_space<vmem>>, %arg13: memref<1x128x256xbf16, #tpu.memory_space<vmem>>, %arg14: memref<1x1x256xf32, #tpu.memory_space<vmem>>, %arg15: memref<1x256x128xbf16, #tpu.memory_space<vmem>>, %arg16: memref<1x1x128xf32, #tpu.memory_space<vmem>>, %arg17: memref<1x1x128xf32, #tpu.memory_space<vmem>>, %arg18: memref<1x1x128xf32, #tpu.memory_space<vmem>>, %arg19: memref<128x128xbf16, #tpu.memory_space<vmem>>, %arg20: memref<1x128xf32, #tpu.memory_space<vmem>>, %arg21: memref<4x1x128xf32, #tpu.memory_space<vmem>>, %arg22: memref<32x128xf32, #tpu.memory_space<vmem>>) attributes {dimension_semantics = [#tpu.dimension_semantics<parallel>, #tpu.dimension_semantics<arbitrary>], iteration_bounds = array<i64: 1, 2>, scalar_prefetch = 0 : i64, scratch_operands = 1 : i64, tpu.core_type = #tpu.core_type<tc>, window_params = [{transform_indices = @transform_0, window_bounds = array<i64: 4, 8, 8>}, {pipeline_mode = #tpu.pipeline_mode<synchronous>, transform_indices = @transform_1, window_bounds = array<i64: 8, 128>}, {pipeline_mode = #tpu.pipeline_mode<synchronous>, transform_indices = @transform_2, window_bounds = array<i64: 1, 128>}, {pipeline_mode = #tpu.pipeline_mode<synchronous>, transform_indices = @transform_3, window_bounds = array<i64: 8, 128>}, {pipeline_mode = #tpu.pipeline_mode<synchronous>, transform_indices = @transform_4, window_bounds = array<i64: 4, 128>}, {transform_indices = @transform_5, window_bounds = array<i64: 1, 128, 384>}, {transform_indices = @transform_6, window_bounds = array<i64: 1, 1, 384>}, {transform_indices = @transform_7, window_bounds = array<i64: 1, 128, 128>}, {transform_indices = @transform_8, window_bounds = array<i64: 1, 1, 128>}, {transform_indices = @transform_9, window_bounds = array<i64: 1, 1, 128>}, {transform_indices = @transform_10, window_bounds = array<i64: 1, 1, 128>}, {transform_indices = @transform_11, window_bounds = array<i64: 1, 128, 256>}, {transform_indices = @transform_12, window_bounds = array<i64: 1, 1, 256>}, {transform_indices = @transform_13, window_bounds = array<i64: 1, 256, 128>}, {transform_indices = @transform_14, window_bounds = array<i64: 1, 1, 128>}, {transform_indices = @transform_15, window_bounds = array<i64: 1, 1, 128>}, {transform_indices = @transform_16, window_bounds = array<i64: 1, 1, 128>}, {pipeline_mode = #tpu.pipeline_mode<synchronous>, transform_indices = @transform_17, window_bounds = array<i64: 128, 128>}, {pipeline_mode = #tpu.pipeline_mode<synchronous>, transform_indices = @transform_18, window_bounds = array<i64: 1, 128>}, {transform_indices = @transform_19, window_bounds = array<i64: 4, 1, 128>}]} {
    %c0_i32 = arith.constant 0 : i32
    %0 = arith.cmpi eq, %arg1, %c0_i32 : i32
    %1 = arith.extui %0 : i1 to i32
    %c0_i32_0 = arith.constant 0 : i32
    %2 = arith.cmpi ne, %1, %c0_i32_0 : i32
    scf.if %2 {
      %c0_63 = arith.constant 0 : index
      %c0_64 = arith.constant 0 : index
      %c0_65 = arith.constant 0 : index
      %130 = vector.load %arg2[%c0_63, %c0_64, %c0_65] : memref<4x8x8xf32, #tpu.memory_space<vmem>>, vector<4x8x8xf32>
      %131 = vector.shape_cast %130 : vector<4x8x8xf32> to vector<32x8xf32>
      %132 = arith.truncf %131 : vector<32x8xf32> to vector<32x8xbf16>
      %c0_66 = arith.constant 0 : index
      %c0_67 = arith.constant 0 : index
      %133 = vector.load %arg3[%c0_66, %c0_67] : memref<8x128xbf16, #tpu.memory_space<vmem>>, vector<8x128xbf16>
      %cst_68 = arith.constant dense<0.000000e+00> : vector<32x128xf32>
      %134 = tpu.matmul %132, %133, %cst_68 {dimension_numbers = #tpu.dot_dimension_numbers<[1], [0], [0], [1], [0, 0, 1, 1], [], []>} : vector<32x8xbf16>, vector<8x128xbf16>, vector<32x128xf32> -> vector<32x128xf32>
      %c0_69 = arith.constant 0 : index
      %c0_70 = arith.constant 0 : index
      %135 = vector.load %arg4[%c0_69, %c0_70] : memref<1x128xf32, #tpu.memory_space<vmem>>, vector<1x128xf32>
      %136 = vector.broadcast %135 : vector<1x128xf32> to vector<32x128xf32>
      %137 = arith.addf %134, %136 : vector<32x128xf32>
      %138 = vector.shape_cast %137 : vector<32x128xf32> to vector<4x8x128xf32>
      %c0_71 = arith.constant 0 : index
      %c0_72 = arith.constant 0 : index
      %139 = vector.load %arg5[%c0_71, %c0_72] : memref<8x128xf32, #tpu.memory_space<vmem>>, vector<8x128xf32>
      %140 = vector.shape_cast %139 : vector<8x128xf32> to vector<1x8x128xf32>
      %141 = vector.broadcast %140 : vector<1x8x128xf32> to vector<4x8x128xf32>
      %142 = arith.addf %138, %141 : vector<4x8x128xf32>
      %143 = vector.shape_cast %142 : vector<4x8x128xf32> to vector<32x128xf32>
      %c0_73 = arith.constant 0 : index
      %c0_74 = arith.constant 0 : index
      %144 = vector.load %arg22[%c0_73, %c0_74] : memref<32x128xf32, #tpu.memory_space<vmem>>, vector<32x128xf32>
      tpu.vector_store %arg22[%c0_73, %c0_74], %143 {strides = array<i32>} : memref<32x128xf32, #tpu.memory_space<vmem>>, vector<32x128xf32>,
    } else {
    }
    %c0 = arith.constant 0 : index
    %c0_1 = arith.constant 0 : index
    %3 = vector.load %arg22[%c0, %c0_1] : memref<32x128xf32, #tpu.memory_space<vmem>>, vector<32x128xf32>
    %4 = arith.truncf %3 : vector<32x128xf32> to vector<32x128xbf16>
    %c0_2 = arith.constant 0 : index
    %c0_3 = arith.constant 0 : index
    %c0_4 = arith.constant 0 : index
    %5 = vector.load %arg7[%c0_2, %c0_3, %c0_4] : memref<1x128x384xbf16, #tpu.memory_space<vmem>>, vector<1x128x384xbf16>
    %6 = vector.shape_cast %5 : vector<1x128x384xbf16> to vector<128x384xbf16>
    %cst = arith.constant dense<0.000000e+00> : vector<32x384xf32>
    %7 = tpu.matmul %4, %6, %cst {dimension_numbers = #tpu.dot_dimension_numbers<[1], [0], [0], [1], [0, 0, 1, 1], [], []>} : vector<32x128xbf16>, vector<128x384xbf16>, vector<32x384xf32> -> vector<32x384xf32>
    %c0_5 = arith.constant 0 : index
    %c0_6 = arith.constant 0 : index
    %c0_7 = arith.constant 0 : index
    %8 = vector.load %arg8[%c0_5, %c0_6, %c0_7] : memref<1x1x384xf32, #tpu.memory_space<vmem>>, vector<1x1x384xf32>
    %9 = vector.shape_cast %8 : vector<1x1x384xf32> to vector<1x384xf32>
    %10 = vector.broadcast %9 : vector<1x384xf32> to vector<32x384xf32>
    %11 = arith.addf %7, %10 : vector<32x384xf32>
    %12 = vector.extract_strided_slice %11 {offsets = [0, 0], sizes = [32, 128], strides = [1, 1]} : vector<32x384xf32> to vector<32x128xf32>
    %13 = vector.shape_cast %12 : vector<32x128xf32> to vector<4x8x128xf32>
    %14 = vector.extract_strided_slice %11 {offsets = [0, 128], sizes = [32, 128], strides = [1, 1]} : vector<32x384xf32> to vector<32x128xf32>
    %15 = vector.shape_cast %14 : vector<32x128xf32> to vector<4x8x128xf32>
    %16 = vector.extract_strided_slice %11 {offsets = [0, 256], sizes = [32, 128], strides = [1, 1]} : vector<32x384xf32> to vector<32x128xf32>
    %17 = vector.shape_cast %16 : vector<32x128xf32> to vector<4x8x128xf32>
    %c0_8 = arith.constant 0 : index
    %c0_9 = arith.constant 0 : index
    %18 = vector.load %arg6[%c0_8, %c0_9] : memref<4x128xf32, #tpu.memory_space<vmem>>, vector<4x128xf32>
    %19 = arith.truncf %18 : vector<4x128xf32> to vector<4x128xbf16>
    %20 = arith.truncf %13 : vector<4x8x128xf32> to vector<4x8x128xbf16>
    %21 = vector.shape_cast %20 : vector<4x8x128xbf16> to vector<4x1x8x128xbf16>
    %22 = vector.shape_cast %19 : vector<4x128xbf16> to vector<1x4x1x128xbf16>
    %23 = vector.broadcast %21 : vector<4x1x8x128xbf16> to vector<4x4x8x128xbf16>
    %24 = vector.broadcast %22 : vector<1x4x1x128xbf16> to vector<4x4x8x128xbf16>
    %25 = arith.mulf %23, %24 : vector<4x4x8x128xbf16>
    %26 = vector.shape_cast %25 : vector<4x4x8x128xbf16> to vector<4x32x128xbf16>
    %27 = arith.truncf %15 : vector<4x8x128xf32> to vector<4x8x128xbf16>
    %28 = arith.truncf %17 : vector<4x8x128xf32> to vector<4x8x128xbf16>
    %cst_10 = arith.constant dense<0.000000e+00> : vector<4x32x8xf32>
    %29 = tpu.matmul %26, %27, %cst_10 {dimension_numbers = #tpu.dot_dimension_numbers<[2], [2], [1], [1], [0, 0, 0, 1, 1, 1], [0], [0]>} : vector<4x32x128xbf16>, vector<4x8x128xbf16>, vector<4x32x8xf32> -> vector<4x32x8xf32>
    %cst_11 = arith.constant 0.176776692 : f32
    %30 = vector.broadcast %cst_11 : f32 to vector<4x32x8xf32>
    %31 = arith.mulf %29, %30 : vector<4x32x8xf32>
    %cst_12 = arith.constant dense<0xFF800000> : vector<4x32xf32>
    %32 = vector.multi_reduction <maximumf>, %31, %cst_12 [2] : vector<4x32x8xf32> to vector<4x32xf32>
    %33 = vector.shape_cast %32 : vector<4x32xf32> to vector<4x32x1xf32>
    %34 = vector.broadcast %33 : vector<4x32x1xf32> to vector<4x32x8xf32>
    %35 = arith.subf %31, %34 : vector<4x32x8xf32>
    %36 = math.exp %35 : vector<4x32x8xf32>
    %cst_13 = arith.constant dense<0.000000e+00> : vector<4x32xf32>
    %37 = vector.multi_reduction <add>, %36, %cst_13 [2] : vector<4x32x8xf32> to vector<4x32xf32>
    %38 = vector.shape_cast %37 : vector<4x32xf32> to vector<4x32x1xf32>
    %39 = tpu.reciprocal %38 {approx = true} : vector<4x32x1xf32> -> vector<4x32x1xf32>
    %40 = vector.broadcast %39 : vector<4x32x1xf32> to vector<4x32x8xf32>
    %41 = arith.mulf %36, %40 : vector<4x32x8xf32>
    %42 = arith.truncf %41 : vector<4x32x8xf32> to vector<4x32x8xbf16>
    %cst_14 = arith.constant dense<0.000000e+00> : vector<4x32x128xf32>
    %43 = tpu.matmul %42, %28, %cst_14 {dimension_numbers = #tpu.dot_dimension_numbers<[2], [1], [1], [2], [0, 0, 0, 1, 1, 2], [0], [0]>} : vector<4x32x8xbf16>, vector<4x8x128xbf16>, vector<4x32x128xf32> -> vector<4x32x128xf32>
    %44 = vector.shape_cast %43 : vector<4x32x128xf32> to vector<4x4x8x128xf32>
    %45 = vector.shape_cast %18 : vector<4x128xf32> to vector<1x4x1x128xf32>
    %46 = vector.broadcast %45 : vector<1x4x1x128xf32> to vector<4x4x8x128xf32>
    %47 = arith.mulf %44, %46 : vector<4x4x8x128xf32>
    %cst_15 = arith.constant dense<0.000000e+00> : vector<4x8x128xf32>
    %48 = vector.multi_reduction <add>, %47, %cst_15 [1] : vector<4x4x8x128xf32> to vector<4x8x128xf32>
    %49 = vector.shape_cast %48 : vector<4x8x128xf32> to vector<32x128xf32>
    %50 = arith.truncf %49 : vector<32x128xf32> to vector<32x128xbf16>
    %c0_16 = arith.constant 0 : index
    %c0_17 = arith.constant 0 : index
    %c0_18 = arith.constant 0 : index
    %51 = vector.load %arg9[%c0_16, %c0_17, %c0_18] : memref<1x128x128xbf16, #tpu.memory_space<vmem>>, vector<1x128x128xbf16>
    %52 = vector.shape_cast %51 : vector<1x128x128xbf16> to vector<128x128xbf16>
    %cst_19 = arith.constant dense<0.000000e+00> : vector<32x128xf32>
    %53 = tpu.matmul %50, %52, %cst_19 {dimension_numbers = #tpu.dot_dimension_numbers<[1], [0], [0], [1], [0, 0, 1, 1], [], []>} : vector<32x128xbf16>, vector<128x128xbf16>, vector<32x128xf32> -> vector<32x128xf32>
    %c0_20 = arith.constant 0 : index
    %c0_21 = arith.constant 0 : index
    %c0_22 = arith.constant 0 : index
    %54 = vector.load %arg10[%c0_20, %c0_21, %c0_22] : memref<1x1x128xf32, #tpu.memory_space<vmem>>, vector<1x1x128xf32>
    %55 = vector.shape_cast %54 : vector<1x1x128xf32> to vector<1x128xf32>
    %56 = vector.broadcast %55 : vector<1x128xf32> to vector<32x128xf32>
    %57 = arith.addf %53, %56 : vector<32x128xf32>
    %58 = arith.addf %3, %57 : vector<32x128xf32>
    %c0_23 = arith.constant 0 : index
    %c0_24 = arith.constant 0 : index
    %c0_25 = arith.constant 0 : index
    %59 = vector.load %arg11[%c0_23, %c0_24, %c0_25] : memref<1x1x128xf32, #tpu.memory_space<vmem>>, vector<1x1x128xf32>
    %60 = vector.shape_cast %59 : vector<1x1x128xf32> to vector<1x128xf32>
    %c0_26 = arith.constant 0 : index
    %c0_27 = arith.constant 0 : index
    %c0_28 = arith.constant 0 : index
    %61 = vector.load %arg12[%c0_26, %c0_27, %c0_28] : memref<1x1x128xf32, #tpu.memory_space<vmem>>, vector<1x1x128xf32>
    %62 = vector.shape_cast %61 : vector<1x1x128xf32> to vector<1x128xf32>
    %cst_29 = arith.constant dense<0.000000e+00> : vector<32xf32>
    %63 = vector.multi_reduction <add>, %58, %cst_29 [1] : vector<32x128xf32> to vector<32xf32>
    %64 = vector.shape_cast %63 : vector<32xf32> to vector<32x1xf32>
    %cst_30 = arith.constant 1.280000e+02 : f32
    %65 = vector.broadcast %cst_30 : f32 to vector<32x1xf32>
    %66 = arith.divf %64, %65 : vector<32x1xf32>
    %67 = vector.broadcast %66 : vector<32x1xf32> to vector<32x128xf32>
    %68 = arith.subf %58, %67 : vector<32x128xf32>
    %69 = arith.mulf %68, %68 : vector<32x128xf32>
    %cst_31 = arith.constant dense<0.000000e+00> : vector<32xf32>
    %70 = vector.multi_reduction <add>, %69, %cst_31 [1] : vector<32x128xf32> to vector<32xf32>
    %71 = vector.shape_cast %70 : vector<32xf32> to vector<32x1xf32>
    %cst_32 = arith.constant 1.280000e+02 : f32
    %72 = vector.broadcast %cst_32 : f32 to vector<32x1xf32>
    %73 = arith.divf %71, %72 : vector<32x1xf32>
    %cst_33 = arith.constant 9.99999974E-6 : f32
    %74 = vector.broadcast %cst_33 : f32 to vector<32x1xf32>
    %75 = arith.addf %73, %74 : vector<32x1xf32>
    %76 = math.rsqrt %75 : vector<32x1xf32>
    %77 = vector.broadcast %76 : vector<32x1xf32> to vector<32x128xf32>
    %78 = arith.mulf %68, %77 : vector<32x128xf32>
    %79 = vector.broadcast %60 : vector<1x128xf32> to vector<32x128xf32>
    %80 = arith.mulf %78, %79 : vector<32x128xf32>
    %81 = vector.broadcast %62 : vector<1x128xf32> to vector<32x128xf32>
    %82 = arith.addf %80, %81 : vector<32x128xf32>
    %83 = arith.truncf %82 : vector<32x128xf32> to vector<32x128xbf16>
    %c0_34 = arith.constant 0 : index
    %c0_35 = arith.constant 0 : index
    %c0_36 = arith.constant 0 : index
    %84 = vector.load %arg13[%c0_34, %c0_35, %c0_36] : memref<1x128x256xbf16, #tpu.memory_space<vmem>>, vector<1x128x256xbf16>
    %85 = vector.shape_cast %84 : vector<1x128x256xbf16> to vector<128x256xbf16>
    %cst_37 = arith.constant dense<0.000000e+00> : vector<32x256xf32>
    %86 = tpu.matmul %83, %85, %cst_37 {dimension_numbers = #tpu.dot_dimension_numbers<[1], [0], [0], [1], [0, 0, 1, 1], [], []>} : vector<32x128xbf16>, vector<128x256xbf16>, vector<32x256xf32> -> vector<32x256xf32>
    %c0_38 = arith.constant 0 : index
    %c0_39 = arith.constant 0 : index
    %c0_40 = arith.constant 0 : index
    %87 = vector.load %arg14[%c0_38, %c0_39, %c0_40] : memref<1x1x256xf32, #tpu.memory_space<vmem>>, vector<1x1x256xf32>
    %88 = vector.shape_cast %87 : vector<1x1x256xf32> to vector<1x256xf32>
    %89 = vector.broadcast %88 : vector<1x256xf32> to vector<32x256xf32>
    %90 = arith.addf %86, %89 : vector<32x256xf32>
    %cst_41 = arith.constant 0.000000e+00 : f32
    %91 = vector.broadcast %cst_41 : f32 to vector<32x256xf32>
    %92 = arith.maximumf %90, %91 : vector<32x256xf32>
    %93 = arith.truncf %92 : vector<32x256xf32> to vector<32x256xbf16>
    %c0_42 = arith.constant 0 : index
    %c0_43 = arith.constant 0 : index
    %c0_44 = arith.constant 0 : index
    %94 = vector.load %arg15[%c0_42, %c0_43, %c0_44] : memref<1x256x128xbf16, #tpu.memory_space<vmem>>, vector<1x256x128xbf16>
    %95 = vector.shape_cast %94 : vector<1x256x128xbf16> to vector<256x128xbf16>
    %cst_45 = arith.constant dense<0.000000e+00> : vector<32x128xf32>
    %96 = tpu.matmul %93, %95, %cst_45 {dimension_numbers = #tpu.dot_dimension_numbers<[1], [0], [0], [1], [0, 0, 1, 1], [], []>} : vector<32x256xbf16>, vector<256x128xbf16>, vector<32x128xf32> -> vector<32x128xf32>
    %c0_46 = arith.constant 0 : index
    %c0_47 = arith.constant 0 : index
    %c0_48 = arith.constant 0 : index
    %97 = vector.load %arg16[%c0_46, %c0_47, %c0_48] : memref<1x1x128xf32, #tpu.memory_space<vmem>>, vector<1x1x128xf32>
    %98 = vector.shape_cast %97 : vector<1x1x128xf32> to vector<1x128xf32>
    %99 = vector.broadcast %98 : vector<1x128xf32> to vector<32x128xf32>
    %100 = arith.addf %96, %99 : vector<32x128xf32>
    %101 = arith.addf %82, %100 : vector<32x128xf32>
    %c0_49 = arith.constant 0 : index
    %c0_50 = arith.constant 0 : index
    %c0_51 = arith.constant 0 : index
    %102 = vector.load %arg17[%c0_49, %c0_50, %c0_51] : memref<1x1x128xf32, #tpu.memory_space<vmem>>, vector<1x1x128xf32>
    %103 = vector.shape_cast %102 : vector<1x1x128xf32> to vector<1x128xf32>
    %c0_52 = arith.constant 0 : index
    %c0_53 = arith.constant 0 : index
    %c0_54 = arith.constant 0 : index
    %104 = vector.load %arg18[%c0_52, %c0_53, %c0_54] : memref<1x1x128xf32, #tpu.memory_space<vmem>>, vector<1x1x128xf32>
    %105 = vector.shape_cast %104 : vector<1x1x128xf32> to vector<1x128xf32>
    %cst_55 = arith.constant dense<0.000000e+00> : vector<32xf32>
    %106 = vector.multi_reduction <add>, %101, %cst_55 [1] : vector<32x128xf32> to vector<32xf32>
    %107 = vector.shape_cast %106 : vector<32xf32> to vector<32x1xf32>
    %cst_56 = arith.constant 1.280000e+02 : f32
    %108 = vector.broadcast %cst_56 : f32 to vector<32x1xf32>
    %109 = arith.divf %107, %108 : vector<32x1xf32>
    %110 = vector.broadcast %109 : vector<32x1xf32> to vector<32x128xf32>
    %111 = arith.subf %101, %110 : vector<32x128xf32>
    %112 = arith.mulf %111, %111 : vector<32x128xf32>
    %cst_57 = arith.constant dense<0.000000e+00> : vector<32xf32>
    %113 = vector.multi_reduction <add>, %112, %cst_57 [1] : vector<32x128xf32> to vector<32xf32>
    %114 = vector.shape_cast %113 : vector<32xf32> to vector<32x1xf32>
    %cst_58 = arith.constant 1.280000e+02 : f32
    %115 = vector.broadcast %cst_58 : f32 to vector<32x1xf32>
    %116 = arith.divf %114, %115 : vector<32x1xf32>
    %cst_59 = arith.constant 9.99999974E-6 : f32
    %117 = vector.broadcast %cst_59 : f32 to vector<32x1xf32>
    %118 = arith.addf %116, %117 : vector<32x1xf32>
    %119 = math.rsqrt %118 : vector<32x1xf32>
    %120 = vector.broadcast %119 : vector<32x1xf32> to vector<32x128xf32>
    %121 = arith.mulf %111, %120 : vector<32x128xf32>
    %122 = vector.broadcast %103 : vector<1x128xf32> to vector<32x128xf32>
    %123 = arith.mulf %121, %122 : vector<32x128xf32>
    %124 = vector.broadcast %105 : vector<1x128xf32> to vector<32x128xf32>
    %125 = arith.addf %123, %124 : vector<32x128xf32>
    %c0_60 = arith.constant 0 : index
    %c0_61 = arith.constant 0 : index
    %126 = vector.load %arg22[%c0_60, %c0_61] : memref<32x128xf32, #tpu.memory_space<vmem>>, vector<32x128xf32>
    tpu.vector_store %arg22[%c0_60, %c0_61], %125 {strides = array<i32>} : memref<32x128xf32, #tpu.memory_space<vmem>>, vector<32x128xf32>,
    %c1_i32 = arith.constant 1 : i32
    %127 = arith.cmpi eq, %arg1, %c1_i32 : i32
    %128 = arith.extui %127 : i1 to i32
    %c0_i32_62 = arith.constant 0 : i32
    %129 = arith.cmpi ne, %128, %c0_i32_62 : i32
    scf.if %129 {
      %c0_63 = arith.constant 0 : index
      %c0_64 = arith.constant 0 : index
      %130 = vector.load %arg22[%c0_63, %c0_64] : memref<32x128xf32, #tpu.memory_space<vmem>>, vector<32x128xf32>
      %131 = vector.shape_cast %130 : vector<32x128xf32> to vector<4x8x128xf32>
      %132 = vector.extract_strided_slice %131 {offsets = [0, 7, 0], sizes = [4, 1, 128], strides = [1, 1, 1]} : vector<4x8x128xf32> to vector<4x1x128xf32>
      %133 = vector.shape_cast %132 : vector<4x1x128xf32> to vector<4x128xf32>
      %134 = arith.truncf %133 : vector<4x128xf32> to vector<4x128xbf16>
      %c0_65 = arith.constant 0 : index
      %c0_66 = arith.constant 0 : index
      %135 = vector.load %arg19[%c0_65, %c0_66] : memref<128x128xbf16, #tpu.memory_space<vmem>>, vector<128x128xbf16>
      %cst_67 = arith.constant dense<0.000000e+00> : vector<4x128xf32>
      %136 = tpu.matmul %134, %135, %cst_67 {dimension_numbers = #tpu.dot_dimension_numbers<[1], [0], [0], [1], [0, 0, 1, 1], [], []>} : vector<4x128xbf16>, vector<128x128xbf16>, vector<4x128xf32> -> vector<4x128xf32>
      %c0_68 = arith.constant 0 : index
      %c0_69 = arith.constant 0 : index
      %137 = vector.load %arg20[%c0_68, %c0_69] : memref<1x128xf32, #tpu.memory_space<vmem>>, vector<1x128xf32>
      %138 = vector.broadcast %137 : vector<1x128xf32> to vector<4x128xf32>
      %139 = arith.addf %136, %138 : vector<4x128xf32>
      %140 = vector.shape_cast %139 : vector<4x128xf32> to vector<4x1x128xf32>
      %c0_70 = arith.constant 0 : index
      %c0_71 = arith.constant 0 : index
      %c0_72 = arith.constant 0 : index
      %141 = vector.load %arg21[%c0_70, %c0_71, %c0_72] : memref<4x1x128xf32, #tpu.memory_space<vmem>>, vector<4x1x128xf32>
      tpu.vector_store %arg21[%c0_70, %c0_71, %c0_72], %140 {strides = array<i32>} : memref<4x1x128xf32, #tpu.memory_space<vmem>>, vector<4x1x128xf32>,
    } else {
    }
    return
  }
  func.func @transform_0(%arg0: i32, %arg1: i32) -> (i32, i32, i32) {
    %c0_i32 = arith.constant 0 : i32
    %c0_i32_0 = arith.constant 0 : i32
    %c0_i32_1 = arith.constant 0 : i32
    return %arg0, %c0_i32, %c0_i32_0 : i32, i32, i32
  }
  func.func @transform_1(%arg0: i32, %arg1: i32) -> (i32, i32) {
    %c0_i32 = arith.constant 0 : i32
    %c0_i32_0 = arith.constant 0 : i32
    %c0_i32_1 = arith.constant 0 : i32
    return %c0_i32, %c0_i32_0 : i32, i32
  }
  func.func @transform_2(%arg0: i32, %arg1: i32) -> (i32, i32) {
    %c0_i32 = arith.constant 0 : i32
    %c0_i32_0 = arith.constant 0 : i32
    %c0_i32_1 = arith.constant 0 : i32
    return %c0_i32, %c0_i32_0 : i32, i32
  }
  func.func @transform_3(%arg0: i32, %arg1: i32) -> (i32, i32) {
    %c0_i32 = arith.constant 0 : i32
    %c0_i32_0 = arith.constant 0 : i32
    %c0_i32_1 = arith.constant 0 : i32
    return %c0_i32, %c0_i32_0 : i32, i32
  }
  func.func @transform_4(%arg0: i32, %arg1: i32) -> (i32, i32) {
    %c0_i32 = arith.constant 0 : i32
    %c0_i32_0 = arith.constant 0 : i32
    %c0_i32_1 = arith.constant 0 : i32
    return %c0_i32, %c0_i32_0 : i32, i32
  }
  func.func @transform_5(%arg0: i32, %arg1: i32) -> (i32, i32, i32) {
    %c0_i32 = arith.constant 0 : i32
    %c0_i32_0 = arith.constant 0 : i32
    %c0_i32_1 = arith.constant 0 : i32
    return %arg1, %c0_i32, %c0_i32_0 : i32, i32, i32
  }
  func.func @transform_6(%arg0: i32, %arg1: i32) -> (i32, i32, i32) {
    %c0_i32 = arith.constant 0 : i32
    %c0_i32_0 = arith.constant 0 : i32
    %c0_i32_1 = arith.constant 0 : i32
    return %arg1, %c0_i32, %c0_i32_0 : i32, i32, i32
  }
  func.func @transform_7(%arg0: i32, %arg1: i32) -> (i32, i32, i32) {
    %c0_i32 = arith.constant 0 : i32
    %c0_i32_0 = arith.constant 0 : i32
    %c0_i32_1 = arith.constant 0 : i32
    return %arg1, %c0_i32, %c0_i32_0 : i32, i32, i32
  }
  func.func @transform_8(%arg0: i32, %arg1: i32) -> (i32, i32, i32) {
    %c0_i32 = arith.constant 0 : i32
    %c0_i32_0 = arith.constant 0 : i32
    %c0_i32_1 = arith.constant 0 : i32
    return %arg1, %c0_i32, %c0_i32_0 : i32, i32, i32
  }
  func.func @transform_9(%arg0: i32, %arg1: i32) -> (i32, i32, i32) {
    %c0_i32 = arith.constant 0 : i32
    %c0_i32_0 = arith.constant 0 : i32
    %c0_i32_1 = arith.constant 0 : i32
    return %arg1, %c0_i32, %c0_i32_0 : i32, i32, i32
  }
  func.func @transform_10(%arg0: i32, %arg1: i32) -> (i32, i32, i32) {
    %c0_i32 = arith.constant 0 : i32
    %c0_i32_0 = arith.constant 0 : i32
    %c0_i32_1 = arith.constant 0 : i32
    return %arg1, %c0_i32, %c0_i32_0 : i32, i32, i32
  }
  func.func @transform_11(%arg0: i32, %arg1: i32) -> (i32, i32, i32) {
    %c0_i32 = arith.constant 0 : i32
    %c0_i32_0 = arith.constant 0 : i32
    %c0_i32_1 = arith.constant 0 : i32
    return %arg1, %c0_i32, %c0_i32_0 : i32, i32, i32
  }
  func.func @transform_12(%arg0: i32, %arg1: i32) -> (i32, i32, i32) {
    %c0_i32 = arith.constant 0 : i32
    %c0_i32_0 = arith.constant 0 : i32
    %c0_i32_1 = arith.constant 0 : i32
    return %arg1, %c0_i32, %c0_i32_0 : i32, i32, i32
  }
  func.func @transform_13(%arg0: i32, %arg1: i32) -> (i32, i32, i32) {
    %c0_i32 = arith.constant 0 : i32
    %c0_i32_0 = arith.constant 0 : i32
    %c0_i32_1 = arith.constant 0 : i32
    return %arg1, %c0_i32, %c0_i32_0 : i32, i32, i32
  }
  func.func @transform_14(%arg0: i32, %arg1: i32) -> (i32, i32, i32) {
    %c0_i32 = arith.constant 0 : i32
    %c0_i32_0 = arith.constant 0 : i32
    %c0_i32_1 = arith.constant 0 : i32
    return %arg1, %c0_i32, %c0_i32_0 : i32, i32, i32
  }
  func.func @transform_15(%arg0: i32, %arg1: i32) -> (i32, i32, i32) {
    %c0_i32 = arith.constant 0 : i32
    %c0_i32_0 = arith.constant 0 : i32
    %c0_i32_1 = arith.constant 0 : i32
    return %arg1, %c0_i32, %c0_i32_0 : i32, i32, i32
  }
  func.func @transform_16(%arg0: i32, %arg1: i32) -> (i32, i32, i32) {
    %c0_i32 = arith.constant 0 : i32
    %c0_i32_0 = arith.constant 0 : i32
    %c0_i32_1 = arith.constant 0 : i32
    return %arg1, %c0_i32, %c0_i32_0 : i32, i32, i32
  }
  func.func @transform_17(%arg0: i32, %arg1: i32) -> (i32, i32) {
    %c0_i32 = arith.constant 0 : i32
    %c0_i32_0 = arith.constant 0 : i32
    %c0_i32_1 = arith.constant 0 : i32
    return %c0_i32, %c0_i32_0 : i32, i32
  }
  func.func @transform_18(%arg0: i32, %arg1: i32) -> (i32, i32) {
    %c0_i32 = arith.constant 0 : i32
    %c0_i32_0 = arith.constant 0 : i32
    %c0_i32_1 = arith.constant 0 : i32
    return %c0_i32, %c0_i32_0 : i32, i32
  }
  func.func @transform_19(%arg0: i32, %arg1: i32) -> (i32, i32, i32) {
    %c0_i32 = arith.constant 0 : i32
    %c0_i32_0 = arith.constant 0 : i32
    %c0_i32_1 = arith.constant 0 : i32
    return %arg0, %c0_i32, %c0_i32_0 : i32, i32, i32
  }
}

</mosaic_0001>

<bundles_post_ra>
// kernel: transformer_forward.1
= control target key start
LH: loop header
LB: loop body
LE: loop exit
PB: predicated region body
PF: predicated region fallthrough
CT: control target
= control target key end

     0   :  { %s4561_s0 = inlined_call_operand.vmem [shape: f32[4,8,8], index: 0, kind: input, shape index: {}]   ;;  %s4562_s1 = inlined_call_operand.vmem [shape: bf16[8,128], index: 1, kind: input, shape index: {}]   ;;  %s4563_s2 = inlined_call_operand.vmem [shape: f32[1,128], index: 2, kind: input, shape index: {}]   ;;  %s4564_s3 = inlined_call_operand.vmem [shape: f32[8,128], index: 3, kind: input, shape index: {}]   ;;  %s4565_s4 = inlined_call_operand.vmem [shape: f32[4,128], index: 4, kind: input, shape index: {}]   ;;  %s4566_s5 = inlined_call_operand.hbm [shape: bf16[2,128,384], index: 5, kind: input, shape index: {}]   ;;  %s4567_s6 = inlined_call_operand.vmem [shape: f32[2,1,384], index: 6, kind: input, shape index: {}]   ;;  %s4568_s7 = inlined_call_operand.hbm [shape: bf16[2,128,128], index: 7, kind: input, shape index: {}]   ;;  %s4569_s8 = inlined_call_operand.vmem [shape: f32[2,1,128], index: 8, kind: input, shape index: {}]   ;;  %s4570_s9 = inlined_call_operand.vmem [shape: f32[2,1,128], index: 9, kind: input, shape index: {}]   ;;  %s4571_s10 = inlined_call_operand.vmem [shape: f32[2,1,128], index: 10, kind: input, shape index: {}]   ;;  %s4572_s11 = inlined_call_operand.vmem [shape: bf16[2,128,256], index: 11, kind: input, shape index: {}]   ;;  %s4573_s12 = inlined_call_operand.vmem [shape: f32[2,1,256], index: 12, kind: input, shape index: {}]   ;;  %s4574_s13 = inlined_call_operand.hbm [shape: bf16[2,256,128], index: 13, kind: input, shape index: {}]   ;;  %s4575_s14 = inlined_call_operand.vmem [shape: f32[2,1,128], index: 14, kind: input, shape index: {}]   ;;  %s4576_s15 = inlined_call_operand.vmem [shape: f32[2,1,128], index: 15, kind: input, shape index: {}]   ;;  %s4577_s16 = inlined_call_operand.vmem [shape: f32[2,1,128], index: 16, kind: input, shape index: {}]   ;;  %s4578_s17 = inlined_call_operand.vmem [shape: bf16[128,128], index: 17, kind: input, shape index: {}]   ;;  %s4579_s18 = inlined_call_operand.vmem [shape: f32[1,128], index: 18, kind: input, shape index: {}]   ;;  %s4580_s19 = inlined_call_operand.vmem [shape: f32[4,1,128], index: 19, kind: output, shape index: {}]  }
   0x1   :  { %4591 = sst [smem:[#allocation15_spill]] %s4561_s0 }
   0x2   :  { %4592 = sst [smem:[#allocation16_spill]] %s4562_s1 }
   0x3   :  { %4593 = sst [smem:[#allocation17_spill]] %s4563_s2 }
   0x4   :  { %4594 = sst [smem:[#allocation18_spill]] %s4564_s3 }
   0x5   :  { %4595 = sst [smem:[#allocation19_spill]] %s4565_s4 }
   0x6   :  { %4596 = sst [smem:[#allocation20_spill]] %s4566_s5 }
   0x7   :  { %4597 = sst [smem:[#allocation21_spill]] %s4567_s6 }
   0x8   :  { %4598 = sst [smem:[#allocation22_spill]] %s4568_s7 }
   0x9   :  { %4599 = sst [smem:[#allocation23_spill]] %s4574_s13 }
   0xa   :  { %4600 = sst [smem:[#allocation24_spill]] %s4575_s14 }
   0xb   :  { %4601 = sst [smem:[#allocation25_spill]] %s4576_s15 }
   0xc   :  { %4602 = sst [smem:[#allocation26_spill]] %s4577_s16 }
   0xd   :  { %4603 = sst [smem:[#allocation27_spill]] %s4578_s17 }
   0xe   :  { %4604 = sst [smem:[#allocation28_spill]] %s4579_s18 }
   0xf   :  { %4605 = sst [smem:[#allocation29_spill]] %s4580_s19 }
  0x10   :  { %24 = vsyncpa [#allocation4], 0 }
  0x11   :  { %26 = vsyncpa [#allocation4 + $0x1], 0 }
  0x12   :  { %27 = vsyncpa [#allocation6], 0 }
  0x13   :  { %29 = vsyncpa [#allocation6 + $0x1], 0  ;;  %s3948_s0 = smov 0   ;;  %s3950_s30 = smov 0  }
  0x14   :  { %s3952_s20 = smov 0   ;;  %s3954_s21 = smov 0  }
  0x15   :  { %s3956_s1 = smov 0   ;;  %s3958_s22 = smov 0  }
  0x16 LB: > { %4606 = sst [smem:[#allocation10_spill]] %s3819_s30  ;;  %s4582_s2 = sadd.s32 4294967295, %s3835_s22   ;;  %s3835_s22 = sphi %s3958_s22, %s35_s22   ;;  %s3831_s1 = sphi %s3956_s1, %s4642_s1   ;;  %s3827_s21 = sphi %s3954_s21, %s4641_s21   ;;  %s3823_s20 = sphi %s3952_s20, %s4640_s20   ;;  %s3819_s30 = sphi %s3950_s30, %s4639_s30   ;;  %s3815_s0 = sphi %s3948_s0, %s4638_s0  }
  0x17   : > { %4607 = sst [smem:[#allocation11_spill]] %s3823_s20  ;;  %s44_s23 = sadd.s32 1, %s3831_s1 }
  0x18   : > { %4608 = sst [smem:[#allocation12_spill]] %s3831_s1  ;;  %p45_p0 = scmp.ge.s32.totalorder %s44_s23, 2 }
  0x19   : > { %s164_s24 = sadd.s32 1, %s3823_s20  ;;  %p171_p1 = scmp.ne.s32.totalorder %s3823_s20, %s3819_s30 }
  0x1a   : > { %p172_p2 = scmp.eq.s32.totalorder %s3835_s22, 0  ;;  %s4644_s23 = smov (%p45_p0, %s44_s23), 0 }
  0x1b   : > { %4609 = sst [smem:[#allocation13_spill]] %s4644_s23  ;;  %p177_p4 = scmp.ne.s32.totalorder %s3819_s30, %s3815_s0 }
  0x1c   : > { %p173_p3 = por %p172_p2, %p171_p1  ;;  %s161_s25 = ssub.s32 %s3831_s1, %s4644_s23 }
  0x1d   : > { %p178_p5 = scmp.eq.s32.totalorder %s4582_s2, 0  ;;  %p162_p6 = scmp.eq.s32.totalorder %s161_s25, 0 }
  0x1e   : > { %p3468_p8 = scmp.lt.s32.totalorder %s3835_s22, 2  ;;  %s3998_s27 = sand.u32 1, %s3823_s20  }
  0x1f   : > { %p3989_p7 = por %p178_p5, %p177_p4  ;;  %s610_s29 = sand.u32 1, %s3835_s22  }
  0x20   : > { %s3995_s26 = scalar_select %p162_p6, %s3823_s20, %s164_s24  }
  0x21   : > { %p4000_p9 = pnand %p3468_p8, %p173_p3  ;;  %s3122_s0 = sshll.u32 %s3998_s27, 6 }
  0x22   : > { %4611 = sst [smem:[#allocation14_spill]] %s3995_s26  ;;  %s3242_s2 = sshll.u32 %s3831_s1, 10 }
  0x23   : > { %s4613_s7 = sld [smem:[#allocation22_spill]]  ;;  %s614_s18 = scalar_lea.vmem [#allocation5], %s3122_s0 }
  0x24   : > { %s621_s17 = sshll.u32 %s614_s18, 4  ;;  %p3128_p10 = scmp.ge.s32.totalorder %s3835_s22, 1  ;;  %s622_s17 = int_to_ptr.vmem [resolvable:$true] %s621_s17 }
  0x25   : > { %s4011_s24 = scalar_lea.sflag [#allocation6], %s610_s29  ;;  %p3699_p11 = pneg %p4000_p9 }
  0x26   : > { %s3710_s26 = scalar_lea.vmem %s622_s17, 1024  ;;  %s3837_s20 = smov [#allocation5]  }
  0x27   : > { %p3711_p12 = scmp.ne.s32.totalorder %s622_s17, %s3710_s26  ;;  %s3715_s4 = sshll.u32 %s3837_s20, 4  ;;  %s3716_s4 = int_to_ptr.vmem [resolvable:$false] %s3715_s4 }
  0x28   : > { %s3717_s16 = scalar_lea.vmem %s3716_s4, 2048  ;;  %p3718_p1 = scmp.lt.s32.totalorder %s622_s17, %s3716_s4 }
  0x29   : > { %s620_s19 = scalar_lea.hbm %s4613_s7, %s3242_s2  ;;  %p3713_p13 = pnand %p3711_p12, %p3699_p11 }
  0x2a   : > { %p3719_p2 = scmp.lt.s32.totalorder %s3717_s16, %s3710_s26 }
  0x2b   : > { %p3714_p0 = pneg %p3713_p13 }
  0x2c   : > { %p3720_p3 = por %p3719_p2, %p3718_p1 }
  0x2e   : > { %p3721_p4 = pnand %p3720_p3, %p3714_p0 }
  0x30   : > { %3724 = shalt.err (!%p3721_p4)
}
  0x31   : > { %s4587_s18 = smov 64   ;;  %s4588_s2 = smov 4  }
  0x32   : > { %3464 = dma.hbm_to_vmem [thread:$0]  (!%p4000_p9), %s620_s19, 1024, %s622_s17, %s4011_s24, %s4587_s18, %s4587_s18, %s4588_s2  }
  0x33   : > { %p701_p5 = scmp.lt.s32.totalorder %s3835_s22, 3  ;;  %s3448_s16 = smul.u32 192, %s3998_s27 }
  0x34   : > { %s3449_s20 = smul.u32 3072, %s3831_s1  ;;  %s4615_s5 = sld [smem:[#allocation20_spill]] }
  0x35   : > { %p4027_p6 = pnand %p3128_p10, %p701_p5  ;;  %s586_s0 = scalar_lea.vmem [#allocation3], %s3448_s16 }
  0x36   : > { %s593_s25 = sshll.u32 %s586_s0, 4  ;;  %s3125_s7 = sshll.u32 %s3998_s27, 7  ;;  %s594_s25 = int_to_ptr.vmem [resolvable:$true] %s593_s25 }
  0x37   : > { %s583_s15 = scalar_lea.sflag [#allocation4], %s3998_s27  ;;  %s3738_s14 = scalar_lea.vmem %s594_s25, 3072 }
  0x38   : > { %p3739_p8 = scmp.ne.s32.totalorder %s594_s25, %s3738_s14  ;;  %s3840_s17 = smov [#allocation3]  }
  0x39   : > { %s3743_s19 = sshll.u32 %s3840_s17, 4  ;;  %s3744_s19 = int_to_ptr.vmem [resolvable:$false] %s3743_s19 }
  0x3a   : > { %s592_s29 = scalar_lea.hbm %s4615_s5, %s3449_s20  ;;  %p3741_p12 = pnand %p3739_p8, %p3699_p11 }
  0x3b   : > { %s3745_s18 = scalar_lea.vmem %s3744_s19, 6144  ;;  %p3746_p13 = scmp.lt.s32.totalorder %s594_s25, %s3744_s19 }
  0x3c   : > { %p3742_p10 = pneg %p3741_p12  ;;  %p3747_p0 = scmp.lt.s32.totalorder %s3745_s18, %s3738_s14 }
  0x3e   : > { %p3748_p1 = por %p3747_p0, %p3746_p13 }
  0x40   : > { %p3749_p2 = pnand %p3748_p1, %p3742_p10 }
  0x42   : > { %3752 = shalt.err (!%p3749_p2)
}
  0x43   : > { %s3841_s16 = smov 192   ;;  %s3842_s27 = smov 12  }
  0x44   : > { %3461 = dma.hbm_to_vmem [thread:$0]  (!%p4000_p9), %s592_s29, 3072, %s594_s25, %s583_s15, %s3841_s16, %s3841_s16, %s3842_s27  }
  0x45   : > { %s3243_s20 = sshll.u32 %s3831_s1, 11  ;;  %s4616_s13 = sld [smem:[#allocation23_spill]] }
  0x46   : > { %s668_s17 = scalar_lea.vmem [#allocation7], %s3125_s7  ;;  %s3843_s14 = smov [#allocation7]  }
  0x47   : > { %s675_s2 = sshll.u32 %s668_s17, 4  ;;  %s3771_s18 = sshll.u32 %s3843_s14, 4  ;;  %s676_s2 = int_to_ptr.vmem [resolvable:$true] %s675_s2  ;;  %s3772_s18 = int_to_ptr.vmem [resolvable:$false] %s3771_s18 }
  0x48   : > { %s3766_s19 = scalar_lea.vmem %s676_s2, 2048  ;;  %s3773_s5 = scalar_lea.vmem %s3772_s18, 4096 }
  0x49   : > { %p3767_p3 = scmp.ne.s32.totalorder %s676_s2, %s3766_s19  ;;  %p3774_p8 = scmp.lt.s32.totalorder %s676_s2, %s3772_s18 }
  0x4a   : > { %p3775_p12 = scmp.lt.s32.totalorder %s3773_s5, %s3766_s19 }
  0x4b   : > { %s674_s0 = scalar_lea.hbm %s4616_s13, %s3243_s20  ;;  %p3769_p4 = pnand %p3767_p3, %p3699_p11 }
  0x4c   : > { %p3776_p10 = por %p3775_p12, %p3774_p8 }
  0x4d   : > { %p3770_p5 = pneg %p3769_p4 }
  0x4f   : > { %p3777_p13 = pnand %p3776_p10, %p3770_p5 }
  0x51   : > { %3780 = shalt.err (!%p3777_p13)
}
  0x52   : > { %s4617_s7 = smov 4   ;;  %s4618_s15 = smov 64  }
  0x53   : > { %3467 = dma.hbm_to_vmem [thread:$0]  (!%p4000_p9), %s674_s0, 2048, %s676_s2, %s4011_s24, %s4618_s15, %s4618_s15, %s4617_s7  }
  0x54   : > { %705 = sbr.rel (%p4027_p6) target bundleno = 2784 (0xae0), region = 96  ;;  %s707_s29 = sand.u32 (!%p4027_p6), 1, %s3819_s30  }
  0x55   : > { %s3450_s25 = smul.u32 (!%p4027_p6), 192, %s707_s29  ;;  %s708_s16 = scalar_lea.sflag (!%p4027_p6), [#allocation4], %s707_s29 }
  0x57   : > { %s4059_s27 = scalar_lea.vmem (!%p4027_p6), [#allocation3], %s3450_s25 }
  0x59   : > { %3806 = dma.done.wait (%p3989_p7), %s708_s16, 3072  }
  0x5a   : > { %3808 = vsyncadd (%p3989_p7), %s708_s16, 4294964224  ;;  %s4619_s5 = sadd.s32 4294967295, %s3835_s22   ;;  %s3129_s24 = sshll.u32 %s707_s29, 6 }
  0x5b   : > { %s716_s28 = sand.u32 1, %s4619_s5   ;;  %s4067_s4 = scalar_lea.vmem [#allocation5], %s3129_s24 }
  0x5c   : > { %s717_s2 = scalar_lea.sflag [#allocation6], %s716_s28 }
  0x5d   : > { %3810 = dma.done.wait (%p3989_p7), %s717_s2, 3072  }
  0x5e   : > { %3812 = vsyncadd (%p3989_p7), %s717_s2, 4294964224  ;;  %s3130_s20 = sshll.u32 %s707_s29, 7  ;;  %p835_p9 = scmp.lt.s32.totalorder %s3827_s21, 1 }
  0x5f   : > { %s4620_s6 = sld [smem:[#allocation21_spill]]  ;;  %p3134_p7 = scmp.ne.s32.totalorder %s3827_s21, 0 }
  0x60   : > { %s4075_s23 = scalar_select %p835_p9, %s3827_s21, 1 }
  0x61   : > { %s4621_s15 = sld [smem:[#allocation24_spill]] }
  0x62   : > { %s3451_s26 = smul.u32 3, %s4075_s23  ;;  %s3244_s28 = sshll.u32 %s4075_s23, 7 }
  0x63   : > { %s4099_s13 = scalar_lea.vmem %s4572_s11, %s3244_s28  ;;  %s3133_s0 = sshll.u32 %s4075_s23, 1 }
  0x64   : > { %s4105_s19 = scalar_lea.vmem %s4573_s12, %s3133_s0  ;;  %s4623_s30 = sld [smem:[#allocation26_spill]] }
  0x65   : > { %s4093_s5 = scalar_lea.vmem %s4620_s6, %s3451_s26  ;;  %s4622_s26 = sld [smem:[#allocation25_spill]] }
  0x66   : > { %s4119_s28 = scalar_lea.vmem [#allocation7], %s3130_s20  ;;  %s4624_s0 = sld [smem:[#allocation16_spill]] (!%p3134_p7) }
  0x67   : > { %s859_s29 = scalar_lea.vmem %s4621_s15, %s4075_s23  ;;  %875 = sbr.rel (%p3134_p7) target bundleno = 318 (0x13e), region = 112 }
  0x68   : > { %s4625_s7 = sld [smem:[#allocation15_spill]] (!%p3134_p7) }
  0x69   : > { %s4626_s3 = sld [smem:[#allocation17_spill]] (!%p3134_p7) }
  0x6a   : > { %s865_s24 = scalar_lea.vmem %s4623_s30, %s4075_s23  ;;  %s4627_s17 = sld [smem:[#allocation18_spill]] (!%p3134_p7) }
  0x6b   : > { %s862_s16 = scalar_lea.vmem %s4622_s26, %s4075_s23 }
  0x6c   : > { %v882_v0 = vld [vmem:[%s4624_s0] sm:$0xf]  ;;  %vm897_vm0 = vcmask 1043456   ;;  %vm890_vm1 = vcmask 64512  }
  0x6d   : > { %3443 = vmatprep.subr.msk.bf16.mxu0 %vm897_vm0, %v882_v0  ;;  %v899_v3 = vsel %vm897_vm0, %v882_v0, 0 }
  0x6e   : > { %v876_v1 = vld [vmem:[%s4625_s7] sm:$0xff]  ;;  %v877_v2 = vld [vmem:[%s4625_s7 + $0x8] sm:$0xff]  ;;  %v878_v5 = vld [vmem:[%s4625_s7 + $0x10] sm:$0xff]  ;;  %3330 = vmatpush3.bf16.msra.mxu0 %v899_v3 }
  0x6f   : > { %v880_v4 = vpack.c.bf16 %v877_v2, %v876_v1  ;;  %v879_v6 = vld [vmem:[%s4625_s7 + $0x18] sm:$0xff]  ;;  %v3135_v8 = vld [vmem:[%s4626_s3] ss:$0 sm:$0xff] }
  0x70   : > { %v881_v7 = vpack.c.bf16 %v879_v6, %v878_v5  ;;  %v950_v10 = vld [vmem:[%s4627_s17] sm:$0xff] }
  0x71   : > { %3331 = vmatprep.mubr.msk.bf16.mxu0 %vm890_vm1, %v880_v4 }
  0x72   : > { %3332 = vmatmul.mubr.msk.bf16.vlgmr.msra.gmra.mxu0 %vm890_vm1, %v881_v7 }
 0x132   : > { %v3333_v9 = vpop.f32.mrf.mxu0 }
 0x133   : > { %v944_v11 = vadd.f32 %v3333_v9, %v3135_v8 }
 0x134   : > { %v935_v12 = vpop.f32.mrf.mxu0 }
 0x135   : > { %v953_v13 = vadd.f32 %v950_v10, %v944_v11  ;;  %v936_v14 = vadd.f32 %v3135_v8, %v935_v12 }
 0x136   : > { %v3334_v15 = vpop.f32.mrf.mxu0 }
 0x137   : > { %957 = vst [vmem:[#allocation2 + $0x18] sm:$0xff] %v953_v13  ;;  %v951_v16 = vadd.f32 %v950_v10, %v936_v14  ;;  %v947_v17 = vadd.f32 %v3334_v15, %v3135_v8 }
 0x138   : > { %v938_v18 = vpop.f32.mrf.mxu0 }
 0x139   : > { %955 = vst [vmem:[#allocation2 + $0x10] sm:$0xff] %v951_v16  ;;  %v954_v19 = vadd.f32 %v950_v10, %v947_v17  ;;  %v939_v20 = vadd.f32 %v3135_v8, %v938_v18 }
 0x13b   : > { %958 = vst [vmem:[#allocation2 + $0x8] sm:$0xff] %v954_v19  ;;  %v952_v21 = vadd.f32 %v950_v10, %v939_v20 }
 0x13d   : > { %956 = vst [vmem:[#allocation2] sm:$0xff] %v952_v21 }
 0x13e PF: > { %v3525_v22 = vld [vmem:[%s4059_s27 + $0xac] ss:$12 sps:$4 sm:$0xff]   ;;  %v3527_v23 = vld [vmem:[%s4059_s27 + $0xa8] ss:$12 sps:$4 sm:$0xff]   ;;  %v3844_v24 = vmov 0   ;;  %v999_v53 = vlaneseq  ;;  %s4628_s15 = sld [smem:[#allocation19_spill]]  ;;  %s4630_s30 = scalar_lea.vmem %s4570_s9, %s4075_s23 }
 0x13f   : > { %1174 = vmatprep.mubr.bf16.mxu0 %v3844_v24  ;;  %1142 = vmatprep.subr.bf16.mxu0 %v3525_v22  ;;  %v3528_v25 = vld [vmem:[%s4059_s27 + $0x94] ss:$12 sps:$4 sm:$0xff]   ;;  %v3530_v26 = vld [vmem:[%s4059_s27 + $0x90] ss:$12 sps:$4 sm:$0xff]   ;;  %v3533_v28 = vld [vmem:[%s4059_s27 + $0x78] ss:$12 sps:$4 sm:$0xff]   ;;  %s4631_s25 = scalar_lea.vmem %s4571_s10, %s4075_s23 }
 0x140   : > { %1143 = vmatpush1.bf16.msra.mxu0 %v3527_v23  ;;  %v3531_v27 = vld [vmem:[%s4059_s27 + $0x7c] ss:$12 sps:$4 sm:$0xff]   ;;  %v3534_v29 = vld [vmem:[%s4059_s27 + $0x64] ss:$12 sps:$4 sm:$0xff]   ;;  %v3536_v31 = vld [vmem:[%s4059_s27 + $0x60] ss:$12 sps:$4 sm:$0xff]  }
 0x141   : > { %1144 = vmatprep.subr.bf16.mxu0 %v3528_v25  ;;  %v959_v30 = vld [vmem:[#allocation2 + $0x10] sm:$0xff]  ;;  %v3537_v32 = vld [vmem:[%s4059_s27 + $0x4c] ss:$12 sps:$4 sm:$0xff]   ;;  %v3543_v41 = vld [vmem:[%s4059_s27 + $0x1c] ss:$12 sps:$4 sm:$0xff]   ;;  %v4169_v56 = vshrl.u32 %v999_v53, 7 }
 0x142   : > { %v3549_v35 = vld [vmem:[%s4059_s27 + $0xb0] ss:$12 sps:$4 sm:$0xff]   ;;  %v3550_v36 = vld [vmem:[%s4059_s27 + $0x98] ss:$12 sps:$4 sm:$0xff]   ;;  %v3539_v37 = vld [vmem:[%s4059_s27 + $0x48] ss:$12 sps:$4 sm:$0xff]  }
 0x143   : > { %3335 = vmatprep.subr.bf16.mxu1 %v3549_v35  ;;  %v3540_v38 = vld [vmem:[%s4059_s27 + $0x34] ss:$12 sps:$4 sm:$0xff]   ;;  %v3542_v40 = vld [vmem:[%s4059_s27 + $0x30] ss:$12 sps:$4 sm:$0xff]   ;;  %v3545_v43 = vld [vmem:[%s4059_s27 + $0x18] ss:$12 sps:$4 sm:$0xff]  }
 0x144   : > { %1145 = vmatpush1.bf16.msra.mxu0 %v3530_v26  ;;  %v960_v33 = vld [vmem:[#allocation2] sm:$0xff]  ;;  %3336 = vmatpush3.bf16.msra.mxu1 %v3549_v35  ;;  %v3552_v42 = vld [vmem:[%s4059_s27 + $0x68] ss:$12 sps:$4 sm:$0xff]   ;;  %v961_v46 = vld [vmem:[#allocation2 + $0x18] sm:$0xff]  ;;  %v3845_v54 = vmov 1966171168  }
 0x145   : > { %1146 = vmatprep.subr.bf16.mxu0 %v3531_v27  ;;  %v963_v34 = vpack.c.bf16 %v960_v33, %v959_v30  ;;  %3337 = vmatprep.subr.bf16.mxu1 %v3550_v36  ;;  %v3551_v39 = vld [vmem:[%s4059_s27 + $0x80] ss:$12 sps:$4 sm:$0xff]   ;;  %v3546_v44 = vld [vmem:[%s4059_s27 + $0x4] ss:$12 sps:$4 sm:$0xff]   ;;  %v3556_v52 = vld [vmem:[%s4059_s27 + $0x8] ss:$12 sps:$4 sm:$0xff]   ;;  %v1252_v55 = vunpack.c.l.s4 %v3845_v54 }
 0x146   : > { %v3548_v45 = vld [vmem:[%s4059_s27] ss:$12 sps:$4 sm:$0xff]   ;;  %v3553_v49 = vld [vmem:[%s4059_s27 + $0x50] ss:$12 sps:$4 sm:$0xff]   ;;  %v3554_v50 = vld [vmem:[%s4059_s27 + $0x38] ss:$12 sps:$4 sm:$0xff]  }
 0x147   : > { %3351 = vmatprep.mubr.bf16.mxu1 %v963_v34  ;;  %v962_v47 = vld [vmem:[#allocation2 + $0x8] sm:$0xff]  ;;  %v1253_v57 = vunpack.c.0.s8 %v1252_v55  ;;  %v4174_v58 = vld [vmem:[%s4628_s15] sm:$0xf]  ;;  %v4185_v3 = vsub.s32 0, %v4169_v56  ;;  %v1005_v11 = vsub.s32 1, %v4169_v56  ;;  %vm1800_vm2 = vcmask 1043456  }
 0x148   : > { %1147 = vmatpush1.bf16.msra.mxu0 %v3533_v28  ;;  %3338 = vmatpush3.bf16.msra.mxu1 %v3550_v36  ;;  %v964_v48 = vpack.c.bf16 %v962_v47, %v961_v46  ;;  %v3555_v51 = vld [vmem:[%s4059_s27 + $0x20] ss:$12 sps:$4 sm:$0xff]   ;;  %v1245_v59 = vpack.c.bf16 %v4174_v58, %v4174_v58  ;;  %vm1609_vm3 = vcmask 64512   ;;  %p3226_p11 = scmp.ne.s32.totalorder %s3827_s21, 1 }
 0x149   : > { %1148 = vmatprep.subr.bf16.mxu0 %v3534_v29  ;;  %3339 = vmatprep.subr.bf16.mxu1 %v3551_v39  ;;  %v4179_v60 = vsub.s32 %v1253_v57, %v4169_v56  ;;  %v4188_v8 = vld [vmem:[%s4093_s5] sm:$0x7]  ;;  %s4629_s5 = scalar_lea.vmem %s4569_s8, %s4075_s23  ;;  %s4636_s3 = sld [smem:[#allocation28_spill]] (!%p3226_p11) }
 0x14a   : > { %v1002_v12 = vrot.slane %v4188_v8, %v4185_v3  ;;  %v1006_v17 = vrot.slane %v4188_v8, %v1005_v11  ;;  %s4637_s17 = sld [smem:[#allocation29_spill]] (!%p3226_p11) }
 0x14b   : > { %v1257_v61 = vrot.slane %v1245_v59, %v4179_v60 }
 0x14c   : > { %1149 = vmatpush1.bf16.msra.mxu0 %v3536_v31  ;;  %3340 = vmatpush3.bf16.msra.mxu1 %v3551_v39 }
 0x14d   : > { %1150 = vmatprep.subr.bf16.mxu0 %v3537_v32  ;;  %3341 = vmatprep.subr.bf16.mxu1 %v3552_v42  ;;  %v1258_v62 = vcombine.high %v1257_v61, %v1257_v61  ;;  %v1265_v63 = vrot.slane %v1257_v61, %v4179_v60 }
 0x14f   : > { %v1272_v0 = vrot.slane %v1258_v62, %v4179_v60  ;;  %v1274_v1 = vunpack.i.h.s16 %v1265_v63  ;;  %v3162_v4 = vpack.i.b16 %v1265_v63, %v1265_v63 }
 0x150   : > { %1151 = vmatpush1.bf16.msra.mxu0 %v3539_v37  ;;  %3342 = vmatpush3.bf16.msra.mxu1 %v3552_v42 }
 0x151   : > { %1152 = vmatprep.subr.bf16.mxu0 %v3540_v38  ;;  %3343 = vmatprep.subr.bf16.mxu1 %v3553_v49  ;;  %v1276_v2 = vunpack.i.h.s16 %v1272_v0  ;;  %v1278_v5 = vpack.i.b16 %v1274_v1, %v1274_v1  ;;  %v3163_v6 = vpack.i.b16 %v1272_v0, %v1272_v0  ;;  %v1284_v9 = vrot.slane %v3162_v4, %v4185_v3 }
 0x153   : > { %v1280_v7 = vpack.i.b16 %v1276_v2, %v1276_v2  ;;  %v1288_v10 = vrot.slane %v1278_v5, %v4185_v3  ;;  %v1292_v13 = vrot.slane %v3163_v6, %v4185_v3  ;;  %v1298_v15 = vpack.i.b16 %v1284_v9, %v1284_v9 }
 0x154   : > { %1153 = vmatpush1.bf16.msra.mxu0 %v3542_v40  ;;  %3344 = vmatpush3.bf16.msra.mxu1 %v3553_v49 }
 0x155   : > { %1154 = vmatprep.subr.bf16.mxu0 %v3543_v41  ;;  %3345 = vmatprep.subr.bf16.mxu1 %v3554_v50  ;;  %v1296_v14 = vrot.slane %v1280_v7, %v4185_v3  ;;  %v1305_v16 = vpack.i.b16 %v1288_v10, %v1288_v10  ;;  %v1312_v20 = vpack.i.b16 %v1292_v13, %v1292_v13 }
 0x156   : > { %v1303_v23 = vrot.slane %v1298_v15, %v4185_v3 }
 0x157   : > { %v1319_v21 = vpack.i.b16 %v1296_v14, %v1296_v14  ;;  %v1310_v25 = vrot.slane %v1305_v16, %v4185_v3  ;;  %v1317_v29 = vrot.slane %v1312_v20, %v4185_v3  ;;  %v1009_v16 = vsub.s32 2, %v4169_v56 }
 0x158   : > { %1155 = vmatpush1.bf16.msra.mxu0 %v3545_v43  ;;  %3346 = vmatpush3.bf16.msra.mxu1 %v3554_v50 }
 0x159   : > { %1156 = vmatprep.subr.bf16.mxu0 %v3546_v44  ;;  %3347 = vmatprep.subr.bf16.mxu1 %v3555_v51  ;;  %v1324_v30 = vrot.slane %v1319_v21, %v4185_v3 }
 0x15c   : > { %1157 = vmatpush1.bf16.msra.mxu0 %v3548_v45  ;;  %3348 = vmatpush3.bf16.msra.mxu1 %v3555_v51 }
 0x15d   : > { %3349 = vmatprep.subr.bf16.mxu1 %v3556_v52 }
 0x15f   : > { %1175 = vmatmul.mubr.bf16.vlgmr.msra.gmra.mxu0 %v963_v34 }
 0x160   : > { %1184 = vmatprep.mubr.bf16.mxu0 %v3844_v24  ;;  %3350 = vmatpush3.bf16.msra.mxu1 %v3556_v52 }
 0x163   : > { %3352 = vmatmul.mubr.bf16.vlgmr.msra.gmra.mxu1 %v964_v48 }
 0x167   : > { %1185 = vmatmul.mubr.bf16.gmra.mxu0 %v964_v48 }
 0x21f   : > { %v1176_v18 = vpop.f32.mrf.mxu0 }
 0x220   : > { %v1177_v19 = vadd.f32 %v1176_v18, %v1002_v12  ;;  %v1010_v18 = vrot.slane %v4188_v8, %v1009_v16 }
 0x221   : > { %v1178_v22 = vpop.f32.mrf.mxu0 }
 0x222   : > { %v1246_v26 = vpack.c.bf16 %v1177_v19, %v1177_v19  ;;  %v1179_v27 = vadd.f32 %v1178_v22, %v1006_v17 }
 0x223   : > { %v1180_v28 = vpop.f32.mrf.mxu0  ;;  %v3353_v15 = vpop.f32.mrf.mxu1 }
 0x224   : > { %v1341_v31 = vpack.c.bf16 %v1179_v27, %v1179_v27  ;;  %v1181_v32 = vadd.f32 %v1180_v28, %v1002_v12  ;;  %v1325_v34 = vmul.bf16 %v1303_v23, %v1246_v26  ;;  %v1326_v35 = vmul.bf16 %v1310_v25, %v1246_v26 }
 0x225   : > { %v1182_v33 = vpop.f32.mrf.mxu0  ;;  %v1327_v40 = vmul.bf16 %v1317_v29, %v1246_v26  ;;  %v1328_v41 = vmul.bf16 %v1324_v30, %v1246_v26  ;;  %v1238_v20 = vadd.f32 %v3353_v15, %v1010_v18 }
 0x226   : > { %v1247_v36 = vpack.c.bf16 %v1181_v32, %v1181_v32  ;;  %v1183_v37 = vadd.f32 %v1182_v33, %v1006_v17  ;;  %3355 = vmatprep.subr.bf16.mxu0 %v1341_v31  ;;  %v3164_v38 = vcombine.low %v1325_v34, %v1326_v35 }
 0x227   : > { %3356 = vmatpush3.bf16.xpose.msra.mxu0 %v1341_v31  ;;  %v1186_v39 = vpop.f32.mrf.mxu0  ;;  %v3165_v50 = vcombine.low %v1327_v40, %v1328_v41  ;;  %v1347_v26 = vpack.c.bf16 %v1238_v20, %v1238_v20 }
 0x228   : > { %v1342_v42 = vpack.c.bf16 %v1183_v37, %v1183_v37  ;;  %v1187_v43 = vadd.f32 %v1186_v39, %v1002_v12  ;;  %3357 = vmatprep.mubr.bf16.mxu0 %v3164_v38  ;;  %v1329_v45 = vmul.bf16 %v1303_v23, %v1247_v36  ;;  %v1330_v46 = vmul.bf16 %v1310_v25, %v1247_v36 }
 0x229   : > { %v1188_v44 = vpop.f32.mrf.mxu0  ;;  %v1331_v1 = vmul.bf16 %v1317_v29, %v1247_v36  ;;  %v1332_v2 = vmul.bf16 %v1324_v30, %v1247_v36 }
 0x22a   : > { %v1248_v47 = vpack.c.bf16 %v1187_v43, %v1187_v43  ;;  %3361 = vmatprep.subr.bf16.mxu0 %v1342_v42  ;;  %v1189_v48 = vadd.f32 %v1188_v44, %v1006_v17  ;;  %v3166_v53 = vcombine.low %v1329_v45, %v1330_v46 }
 0x22b   : > { %v1190_v49 = vpop.f32.mrf.mxu0  ;;  %v3167_v9 = vcombine.low %v1331_v1, %v1332_v2 }
 0x22c   : > { %v1343_v51 = vpack.c.bf16 %v1189_v48, %v1189_v48  ;;  %v1191_v52 = vadd.f32 %v1190_v49, %v1002_v12  ;;  %v1333_v55 = vmul.bf16 %v1303_v23, %v1248_v47  ;;  %v1334_v57 = vmul.bf16 %v1310_v25, %v1248_v47 }
 0x22d   : > { %v1192_v54 = vpop.f32.mrf.mxu0  ;;  %v1335_v62 = vmul.bf16 %v1317_v29, %v1248_v47  ;;  %v1336_v63 = vmul.bf16 %v1324_v30, %v1248_v47 }
 0x22e   : > { %3358 = vmatmul.mubr.bf16.vlgmr.msra.gmra.mxu0 %v3165_v50  ;;  %v1249_v59 = vpack.c.bf16 %v1191_v52, %v1191_v52  ;;  %3367 = vmatprep.subr.bf16.mxu1 %v1343_v51  ;;  %v1193_v61 = vadd.f32 %v1192_v54, %v1006_v17  ;;  %v3168_v0 = vcombine.low %v1333_v55, %v1334_v57  ;;  %v1229_v17 = vpop.f32.mrf.mxu1 }
 0x22f   : > { %3362 = vmatpush3.bf16.xpose.msra.mxu0 %v1342_v42  ;;  %3363 = vmatprep.mubr.bf16.mxu0 %v3166_v53  ;;  %v3169_v7 = vcombine.low %v1335_v62, %v1336_v63  ;;  %v1230_v21 = vadd.f32 %v1229_v17, %v1010_v18 }
 0x230   : > { %v1344_v4 = vpack.c.bf16 %v1193_v61, %v1193_v61  ;;  %3368 = vmatpush3.bf16.xpose.msra.mxu1 %v1343_v51  ;;  %v1337_v5 = vmul.bf16 %v1303_v23, %v1249_v59  ;;  %3369 = vmatprep.mubr.bf16.mxu1 %v3168_v0  ;;  %v1338_v6 = vmul.bf16 %v1310_v25, %v1249_v59  ;;  %v3354_v19 = vpop.f32.mrf.mxu1 }
 0x231   : > { %v1339_v12 = vmul.bf16 %v1317_v29, %v1249_v59  ;;  %v1340_v13 = vmul.bf16 %v1324_v30, %v1249_v59  ;;  %v1241_v22 = vadd.f32 %v3354_v19, %v1010_v18  ;;  %v1345_v27 = vpack.c.bf16 %v1230_v21, %v1230_v21 }
 0x232   : > { %3373 = vmatprep.subr.bf16.mxu0 %v1344_v4  ;;  %v3170_v10 = vcombine.low %v1337_v5, %v1338_v6  ;;  %v1232_v23 = vpop.f32.mrf.mxu1  ;;  %v4206_v30 = vsel %vm1800_vm2, %v1347_v26, 0 }
 0x233   : > { %v3171_v14 = vcombine.low %v1339_v12, %v1340_v13  ;;  %v1233_v25 = vadd.f32 %v1232_v23, %v1010_v18  ;;  %v1348_v28 = vpack.c.bf16 %v1241_v22, %v1241_v22  ;;  %v1802_v31 = vsel %vm1800_vm2, %v1345_v27, 0  ;;  %3444 = vmatprep.subr.msk.bf16.mxu1 %vm1800_vm2, %v1345_v27 }
 0x235   : > { %v1346_v29 = vpack.c.bf16 %v1233_v25, %v1233_v25  ;;  %v4208_v32 = vsel %vm1800_vm2, %v1348_v28, 0 }
 0x236   : > { %3364 = vmatmul.mubr.bf16.vlgmr.msra.gmra.mxu0 %v3167_v9 }
 0x237   : > { %3374 = vmatpush3.bf16.xpose.msra.mxu0 %v1344_v4  ;;  %3370 = vmatmul.mubr.bf16.vlgmr.msra.gmra.mxu1 %v3169_v7  ;;  %v1860_v33 = vsel %vm1800_vm2, %v1346_v29, 0 }
 0x238   : > { %3375 = vmatprep.mubr.bf16.mxu0 %v3170_v10  ;;  %3445 = vmatprep.subr.msk.bf16.mxu0 %vm1800_vm2, %v1346_v29 }
 0x239   : > { %3380 = vmatpush3.bf16.msra.mxu1 %v1802_v31 }
 0x23a   : > { %3446 = vmatprep.subr.msk.bf16.mxu1 %vm1800_vm2, %v1347_v26 }
 0x23e   : > { %3376 = vmatmul.mubr.bf16.vlgmr.msra.gmra.mxu0 %v3171_v14 }
 0x23f   : > { %3386 = vmatpush3.bf16.msra.mxu0 %v1860_v33 }
 0x240   : > { %3447 = vmatprep.subr.msk.bf16.mxu0 %vm1800_vm2, %v1348_v28 }
 0x2ee   : > { %v3359_v8 = vpop.f32.mrf.mxu0 }
 0x2ef   : > { %v4210_v34 = vmul.f32 0.17677669, %v3359_v8 }
 0x2f0   : > { %v1395_v35 = vpop.f32.mrf.mxu0 }
 0x2f1   : > { %v4212_v36 = vmul.f32 0.17677669, %v1395_v35  ;;  %v1616_v37 = vsel %vm1609_vm3, %v4210_v34, -inf }
 0x2f2   : > { %1617 = vmax.xlane.f32.xlu0 %v1616_v37  ;;  %v3360_v38 = vpop.f32.mrf.mxu0 }
 0x2f3   : > { %v4216_v39 = vmul.f32 0.17677669, %v3360_v38  ;;  %v1610_v42 = vsel %vm1609_vm3, %v4212_v36, -inf }
 0x2f4   : > { %v1398_v40 = vpop.f32.mrf.mxu0 }
 0x2f5   : > { %v4218_v41 = vmul.f32 0.17677669, %v1398_v40  ;;  %v1619_v43 = vsel %vm1609_vm3, %v4216_v39, -inf }
 0x2f6   : > { %1611 = vmax.xlane.f32.xlu0 %v1610_v42  ;;  %1620 = vmax.xlane.f32.xlu1 %v1619_v43  ;;  %v3365_v44 = vpop.f32.mrf.mxu0 }
 0x2f7   : > { %v3371_v45 = vpop.f32.mrf.mxu1  ;;  %v4224_v47 = vmul.f32 0.17677669, %v3365_v44  ;;  %v1613_v50 = vsel %vm1609_vm3, %v4218_v41, -inf }
 0x2f8   : > { %v1456_v46 = vpop.f32.mrf.mxu0  ;;  %v4234_v57 = vmul.f32 0.17677669, %v3371_v45 }
 0x2f9   : > { %v4226_v48 = vmul.f32 0.17677669, %v1456_v46  ;;  %v1517_v49 = vpop.f32.mrf.mxu1  ;;  %v1628_v59 = vsel %vm1609_vm3, %v4224_v47, -inf }
 0x2fa   : > { %1614 = vmax.xlane.f32.xlu0 %v1613_v50  ;;  %v3366_v51 = vpop.f32.mrf.mxu0  ;;  %v4242_v1 = vmul.f32 0.17677669, %v1517_v49  ;;  %v1640_v2 = vsel %vm1609_vm3, %v4234_v57, -inf }
 0x2fb   : > { %v4230_v52 = vmul.f32 0.17677669, %v3366_v51  ;;  %v1622_v53 = vsel %vm1609_vm3, %v4226_v48, -inf  ;;  %v3372_v54 = vpop.f32.mrf.mxu1 }
 0x2fc   : > { %1623 = vmax.xlane.f32.xlu1 %v1622_v53  ;;  %v1459_v55 = vpop.f32.mrf.mxu0  ;;  %v4238_v62 = vmul.f32 0.17677669, %v3372_v54  ;;  %v1634_v10 = vsel %vm1609_vm3, %v4242_v1, -inf }
 0x2fd   : > { %v1631_v63 = vsel %vm1609_vm3, %v4230_v52, -inf  ;;  %v4246_v4 = vmul.f32 0.17677669, %v1459_v55  ;;  %v1520_v6 = vpop.f32.mrf.mxu1 }
 0x2fe   : > { %1629 = vmax.xlane.f32.xlu0 %v1628_v59  ;;  %v3377_v61 = vpop.f32.mrf.mxu0  ;;  %v1643_v5 = vsel %vm1609_vm3, %v4238_v62, -inf  ;;  %v4254_v12 = vmul.f32 0.17677669, %v1520_v6 }
 0x2ff   : > { %v1625_v13 = vsel %vm1609_vm3, %v4246_v4, -inf  ;;  %v4258_v15 = vmul.f32 0.17677669, %v3377_v61 }
 0x300   : > { %1632 = vmax.xlane.f32.xlu1 %v1631_v63  ;;  %v1578_v0 = vpop.f32.mrf.mxu0  ;;  %v1637_v18 = vsel %vm1609_vm3, %v4254_v12, -inf }
 0x301   : > { %v4250_v9 = vmul.f32 0.17677669, %v1578_v0  ;;  %v1652_v19 = vsel %vm1609_vm3, %v4258_v15, -inf }
 0x302   : > { %1641 = vmax.xlane.f32.xlu0 %v1640_v2  ;;  %v3378_v7 = vpop.f32.mrf.mxu0 }
 0x303   : > { %v1646_v16 = vsel %vm1609_vm3, %v4250_v9, -inf  ;;  %v4268_v20 = vmul.f32 0.17677669, %v3378_v7 }
 0x304   : > { %1644 = vmax.xlane.f32.xlu1 %v1643_v5  ;;  %v1581_v14 = vpop.f32.mrf.mxu0 }
 0x305   : > { %v4262_v17 = vmul.f32 0.17677669, %v1581_v14  ;;  %v1655_v22 = vsel %vm1609_vm3, %v4268_v20, -inf }
 0x306   : > { %1635 = vmax.xlane.f32.xlu0 %v1634_v10 }
 0x307   : > { %v1649_v21 = vsel %vm1609_vm3, %v4262_v17, -inf }
 0x308   : > { %1626 = vmax.xlane.f32.xlu1 %v1625_v13 }
 0x30a   : > { %1647 = vmax.xlane.f32.xlu0 %v1646_v16 }
 0x30c   : > { %1638 = vmax.xlane.f32.xlu1 %v1637_v18 }
 0x30e   : > { %1653 = vmax.xlane.f32.xlu0 %v1652_v19 }
 0x310   : > { %1650 = vmax.xlane.f32.xlu1 %v1649_v21 }
 0x314   : > { %1656 = vmax.xlane.f32.xlu1 %v1655_v22 }
 0x37b   : > { %v1618_v23 = vpop.xlane.xlu0 %1617 }
 0x37c   : > { %v1660_v25 = vsub.f32 %v4210_v34, %v1618_v23 }
 0x37e   : > { %v1678_v26 = vmul.f32 1.442695, %v1660_v25 }
 0x37f   : > { %v1612_v27 = vpop.xlane.xlu0 %1611  ;;  %v1621_v28 = vpop.xlane.xlu1 %1620 }
 0x380   : > { %3605 = vpow2.f32 %v1678_v26  ;;  %v1658_v29 = vsub.f32 %v4212_v36, %v1612_v27  ;;  %v1661_v31 = vsub.f32 %v4216_v39, %v1621_v28 }
 0x382   : > { %v1674_v33 = vmul.f32 1.442695, %v1658_v29  ;;  %v1680_v8 = vmul.f32 1.442695, %v1661_v31 }
 0x383   : > { %v1615_v35 = vpop.xlane.xlu0 %1614 }
 0x384   : > { %3607 = vpow2.f32 %v1674_v33  ;;  %v1659_v37 = vsub.f32 %v4218_v41, %v1615_v35 }
 0x385   : > { %3609 = vpow2.f32 %v1680_v8  ;;  %v1624_v38 = vpop.xlane.xlu1 %1623 }
 0x386   : > { %v1676_v40 = vmul.f32 1.442695, %v1659_v37  ;;  %v1662_v43 = vsub.f32 %v4226_v48, %v1624_v38 }
 0x387   : > { %v1630_v42 = vpop.xlane.xlu0 %1629 }
 0x388   : > { %3611 = vpow2.f32 %v1676_v40  ;;  %v1664_v34 = vsub.f32 %v4224_v47, %v1630_v42  ;;  %v1682_v41 = vmul.f32 1.442695, %v1662_v43 }
 0x389   : > { %v1633_v44 = vpop.xlane.xlu1 %1632 }
 0x38a   : > { %v1686_v45 = vmul.f32 1.442695, %v1664_v34  ;;  %v1665_v36 = vsub.f32 %v4230_v52, %v1633_v44 }
 0x38b   : > { %v1642_v39 = vpop.xlane.xlu0 %1641 }
 0x38c   : > { %3613 = vpow2.f32 %v1686_v45  ;;  %v1688_v46 = vmul.f32 1.442695, %v1665_v36  ;;  %v1668_v49 = vsub.f32 %v4234_v57, %v1642_v39 }
 0x38d   : > { %v4282_v50 = vpop.eup %3605  ;;  %v1645_v51 = vpop.xlane.xlu1 %1644 }
 0x38e   : > { %3615 = vpow2.f32 %v1688_v46  ;;  %v1694_v53 = vmul.f32 1.442695, %v1668_v49  ;;  %v1669_v54 = vsub.f32 %v4238_v62, %v1645_v51  ;;  %v1712_v47 = vsel %vm1609_vm3, %v4282_v50, 0.0 }
 0x38f   : > { %v1636_v48 = vpop.xlane.xlu0 %1635  ;;  %1713 = vadd.xlane.f32.xlu0 %v1712_v47 }
 0x390   : > { %3617 = vpow2.f32 %v1694_v53  ;;  %v1696_v52 = vmul.f32 1.442695, %v1669_v54  ;;  %v1666_v55 = vsub.f32 %v4242_v1, %v1636_v48 }
 0x391   : > { %v4288_v59 = vpop.eup %3607  ;;  %3619 = vpow2.f32 %v1682_v41  ;;  %v1627_v57 = vpop.xlane.xlu1 %1626 }
 0x392   : > { %v4290_v61 = vpop.eup %3609  ;;  %3621 = vpow2.f32 %v1696_v52  ;;  %v1690_v63 = vmul.f32 1.442695, %v1666_v55  ;;  %v1663_v0 = vsub.f32 %v4246_v4, %v1627_v57  ;;  %v1706_v62 = vsel %vm1609_vm3, %v4288_v59, 0.0 }
 0x393   : > { %1707 = vadd.xlane.f32.xlu0 %v1706_v62  ;;  %v1648_v2 = vpop.xlane.xlu0 %1647  ;;  %v1715_v5 = vsel %vm1609_vm3, %v4290_v61, 0.0 }
 0x394   : > { %v1684_v6 = vmul.f32 1.442695, %v1663_v0  ;;  %v1670_v1 = vsub.f32 %v4250_v9, %v1648_v2  ;;  %1716 = vadd.xlane.f32.xlu1 %v1715_v5  ;;  %3623 = vpow2.f32 %v1690_v63 }
 0x395   : > { %v4298_v7 = vpop.eup %3611  ;;  %v1639_v10 = vpop.xlane.xlu1 %1638 }
 0x396   : > { %3625 = vpow2.f32 %v1684_v6  ;;  %v1698_v13 = vmul.f32 1.442695, %v1670_v1  ;;  %v1667_v4 = vsub.f32 %v4254_v12, %v1639_v10  ;;  %v1709_v14 = vsel %vm1609_vm3, %v4298_v7, 0.0 }
 0x397   : > { %v1654_v16 = vpop.xlane.xlu0 %1653 }
 0x398   : > { %v1692_v18 = vmul.f32 1.442695, %v1667_v4  ;;  %v1672_v19 = vsub.f32 %v4258_v15, %v1654_v16  ;;  %1710 = vadd.xlane.f32.xlu1 %v1709_v14  ;;  %3627 = vpow2.f32 %v1698_v13 }
 0x399   : > { %v4304_v21 = vpop.eup %3613  ;;  %v1651_v9 = vpop.xlane.xlu1 %1650 }
 0x39a   : > { %3629 = vpow2.f32 %v1692_v18  ;;  %v1702_v22 = vmul.f32 1.442695, %v1672_v19  ;;  %v1671_v23 = vsub.f32 %v4262_v17, %v1651_v9  ;;  %v1724_v25 = vsel %vm1609_vm3, %v4304_v21, 0.0 }
 0x39b   : > { %v4309_v12 = vpop.eup %3615  ;;  %1725 = vadd.xlane.f32.xlu0 %v1724_v25 }
 0x39c   : > { %v1700_v26 = vmul.f32 1.442695, %v1671_v23  ;;  %v1727_v27 = vsel %vm1609_vm3, %v4309_v12, 0.0  ;;  %3631 = vpow2.f32 %v1702_v22 }
 0x39d   : > { %v4313_v15 = vpop.eup %3617  ;;  %1728 = vadd.xlane.f32.xlu1 %v1727_v27  ;;  %v1657_v28 = vpop.xlane.xlu1 %1656 }
 0x39e   : > { %v4315_v29 = vpop.eup %3619  ;;  %3633 = vpow2.f32 %v1700_v26  ;;  %v1673_v17 = vsub.f32 %v4268_v20, %v1657_v28  ;;  %v1736_v31 = vsel %vm1609_vm3, %v4313_v15, 0.0 }
 0x39f   : > { %v4320_v33 = vpop.eup %3621  ;;  %1737 = vadd.xlane.f32.xlu0 %v1736_v31  ;;  %v1718_v38 = vsel %vm1609_vm3, %v4315_v29, 0.0 }
 0x3a0   : > { %v1704_v8 = vmul.f32 1.442695, %v1673_v17  ;;  %v1739_v35 = vsel %vm1609_vm3, %v4320_v33, 0.0 }
 0x3a1   : > { %1740 = vadd.xlane.f32.xlu1 %v1739_v35  ;;  %v4324_v37 = vpop.eup %3623 }
 0x3a2   : > { %3635 = vpow2.f32 %v1704_v8  ;;  %v1730_v34 = vsel %vm1609_vm3, %v4324_v37, 0.0 }
 0x3a3   : > { %v4328_v40 = vpop.eup %3625  ;;  %1719 = vadd.xlane.f32.xlu0 %v1718_v38 }
 0x3a4   : > { %v1721_v20 = vsel %vm1609_vm3, %v4328_v40, 0.0 }
 0x3a5   : > { %1722 = vadd.xlane.f32.xlu1 %v1721_v20  ;;  %v4332_v42 = vpop.eup %3627 }
 0x3a6   : > { %v1742_v36 = vsel %vm1609_vm3, %v4332_v42, 0.0 }
 0x3a7   : > { %v4336_v43 = vpop.eup %3629  ;;  %1731 = vadd.xlane.f32.xlu0 %v1730_v34 }
 0x3a8   : > { %v1733_v44 = vsel %vm1609_vm3, %v4336_v43, 0.0 }
 0x3a9   : > { %1734 = vadd.xlane.f32.xlu1 %v1733_v44  ;;  %v4340_v45 = vpop.eup %3631 }
 0x3aa   : > { %v1748_v49 = vsel %vm1609_vm3, %v4340_v45, 0.0 }
 0x3ab   : > { %v4344_v39 = vpop.eup %3633  ;;  %1743 = vadd.xlane.f32.xlu0 %v1742_v36 }
 0x3ac   : > { %v1745_v46 = vsel %vm1609_vm3, %v4344_v39, 0.0 }
 0x3ad   : > { %1746 = vadd.xlane.f32.xlu1 %v1745_v46 }
 0x3af   : > { %v4350_v41 = vpop.eup %3635  ;;  %1749 = vadd.xlane.f32.xlu0 %v1748_v49 }
 0x3b0   : > { %v1751_v51 = vsel %vm1609_vm3, %v4350_v41, 0.0 }
 0x3b1   : > { %1752 = vadd.xlane.f32.xlu1 %v1751_v51 }
 0x418   : > { %v1714_v53 = vpop.xlane.xlu0 %1713 }
 0x41c   : > { %v1708_v54 = vpop.xlane.xlu0 %1707 }
 0x41d   : > { %v1717_v47 = vpop.xlane.xlu1 %1716 }
 0x41e   : > { %3637 = vrcp.f32 %v1717_v47  ;;  %v3559_v47 = vld [vmem:[%s4067_s4 + $0x28] sm:$0xff]  }
 0x41f   : > { %3639 = vrcp.f32 %v1708_v54 }
 0x420   : > { %3641 = vrcp.f32 %v1714_v53 }
 0x421   : > { %v1711_v48 = vpop.xlane.xlu1 %1710 }
 0x422   : > { %3643 = vrcp.f32 %v1711_v48  ;;  %v3562_v48 = vld [vmem:[%s4067_s4 + $0x10] sm:$0xff]  }
 0x424   : > { %v1726_v52 = vpop.xlane.xlu0 %1725 }
 0x426   : > { %v1729_v55 = vpop.xlane.xlu1 %1728 }
 0x427   : > { %3645 = vrcp.f32 %v1729_v55  ;;  %v3564_v55 = vld [vmem:[%s4067_s4] sm:$0xff]  }
 0x428   : > { %v1738_v57 = vpop.xlane.xlu0 %1737 }
 0x42a   : > { %v1741_v63 = vpop.xlane.xlu1 %1740 }
 0x42b   : > { %v3638_v0 = vpop.eup %3637 }
 0x42c   : > { %v1720_v62 = vpop.xlane.xlu0 %1719  ;;  %v3640_v2 = vpop.eup %3639  ;;  %v1773_v10 = vmul.f32 %v3638_v0, %v4290_v61 }
 0x42d   : > { %3647 = vrcp.f32 %v1720_v62  ;;  %v3642_v5 = vpop.eup %3641  ;;  %v1770_v4 = vmul.f32 %v3640_v2, %v4288_v59 }
 0x42e   : > { %3649 = vrcp.f32 %v1726_v52  ;;  %v1723_v6 = vpop.xlane.xlu1 %1722  ;;  %v1772_v16 = vmul.f32 %v3642_v5, %v4282_v50  ;;  %v3563_v52 = vld [vmem:[%s4067_s4 + $0x8] sm:$0xff]  }
 0x42f   : > { %v3644_v1 = vpop.eup %3643  ;;  %3651 = vrcp.f32 %v1723_v6 }
 0x430   : > { %3653 = vrcp.f32 %v1741_v63  ;;  %v1732_v13 = vpop.xlane.xlu0 %1731  ;;  %v1771_v14 = vmul.f32 %v3644_v1, %v4298_v7  ;;  %v1787_v9 = vpack.c.bf16 %v1773_v10, %v1772_v16  ;;  %v2034_v63 = vrot.slane %v4174_v58, %v4179_v60 }
 0x431   : > { %3655 = vrcp.f32 %v1732_v13 }
 0x432   : > { %3657 = vrcp.f32 %v1738_v57  ;;  %v1735_v18 = vpop.xlane.xlu1 %1734  ;;  %v1786_v19 = vpack.c.bf16 %v1771_v14, %v1770_v4  ;;  %v2035_v62 = vcombine.high %v2034_v63, %v2034_v63  ;;  %v2042_v5 = vrot.slane %v2034_v63, %v4179_v60 }
 0x433   : > { %3659 = vrcp.f32 %v1735_v18 }
 0x434   : > { %3381 = vmatprep.mubr.msk.bf16.mxu1 %vm1609_vm3, %v1786_v19  ;;  %v1744_v22 = vpop.xlane.xlu0 %1743  ;;  %v3646_v7 = vpop.eup %3645  ;;  %v2049_v6 = vrot.slane %v2035_v62, %v4179_v60  ;;  %v2050_v13 = vcombine.high %v2042_v5, %v2042_v5  ;;  %v2055_v4 = vrot.slane %v2042_v5, %v4185_v3  ;;  %v3685_v62 = vld [vmem:[#allocation2 + $0x10] sm:$0xff] }
 0x435   : > { %3661 = vrcp.f32 %v1744_v22  ;;  %3382 = vmatmul.mubr.msk.bf16.vlgmr.msra.gmra.mxu1 %vm1609_vm3, %v1787_v9  ;;  %v1777_v27 = vmul.f32 %v3646_v7, %v4309_v12 }
 0x436   : > { %3392 = vmatpush3.bf16.msra.mxu1 %v4206_v30  ;;  %v1747_v61 = vpop.xlane.xlu1 %1746  ;;  %v2059_v1 = vrot.slane %v2049_v6, %v4185_v3  ;;  %v2063_v19 = vrot.slane %v2050_v13, %v4185_v3  ;;  %v2051_v58 = vcombine.high %v2049_v6, %v2049_v6 }
 0x437   : > { %3663 = vrcp.f32 %v1747_v61 }
 0x438   : > { %v1750_v59 = vpop.xlane.xlu0 %1749 }
 0x439   : > { %3665 = vrcp.f32 %v1750_v59 }
 0x43a   : > { %v3648_v23 = vpop.eup %3647  ;;  %v1753_v50 = vpop.xlane.xlu1 %1752 }
 0x43b   : > { %v3650_v25 = vpop.eup %3649  ;;  %3667 = vrcp.f32 %v1753_v50  ;;  %v1774_v17 = vmul.f32 %v3648_v23, %v4315_v29 }
 0x43c   : > { %v3652_v26 = vpop.eup %3651  ;;  %v1776_v30 = vmul.f32 %v3650_v25, %v4304_v21  ;;  %v2067_v25 = vrot.slane %v2051_v58, %v4185_v3 }
 0x43d   : > { %v3654_v28 = vpop.eup %3653  ;;  %v1775_v31 = vmul.f32 %v3652_v26, %v4328_v40 }
 0x43e   : > { %v3656_v8 = vpop.eup %3655  ;;  %v1789_v34 = vpack.c.bf16 %v1777_v27, %v1776_v30  ;;  %v1781_v44 = vmul.f32 %v3654_v28, %v4320_v33 }
 0x43f   : > { %v3658_v35 = vpop.eup %3657  ;;  %v1788_v38 = vpack.c.bf16 %v1775_v31, %v1774_v17  ;;  %v1778_v36 = vmul.f32 %v3656_v8, %v4324_v37 }
 0x440   : > { %v3660_v20 = vpop.eup %3659  ;;  %v1780_v29 = vmul.f32 %v3658_v35, %v4313_v15 }
 0x441   : > { %3387 = vmatprep.mubr.msk.bf16.mxu0 %vm1609_vm3, %v1788_v38  ;;  %v1779_v12 = vmul.f32 %v3660_v20, %v4336_v43 }
 0x442   : > { %v3662_v46 = vpop.eup %3661  ;;  %3388 = vmatmul.mubr.msk.bf16.vlgmr.msra.gmra.mxu0 %vm1609_vm3, %v1789_v34  ;;  %v1791_v49 = vpack.c.bf16 %v1781_v44, %v1780_v29 }
 0x443   : > { %3398 = vmatpush3.bf16.msra.mxu0 %v4208_v32  ;;  %v1790_v21 = vpack.c.bf16 %v1779_v12, %v1778_v36  ;;  %v1782_v33 = vmul.f32 %v3662_v46, %v4332_v42  ;;  %v3557_v42 = vld [vmem:[%s4067_s4 + $0x38] sm:$0xff]  }
 0x444   : > { %v3664_v40 = vpop.eup %3663  ;;  %3403 = vmatprep.subr.bf16.mxu1 %v3557_v42 }
 0x445   : > { %3393 = vmatprep.mubr.msk.bf16.mxu1 %vm1609_vm3, %v1790_v21  ;;  %v1783_v37 = vmul.f32 %v3664_v40, %v4344_v39  ;;  %v3558_v39 = vld [vmem:[%s4067_s4 + $0x30] sm:$0xff]  }
 0x446   : > { %v3666_v51 = vpop.eup %3665  ;;  %3394 = vmatmul.mubr.msk.bf16.vlgmr.msra.gmra.mxu1 %vm1609_vm3, %v1791_v49 }
 0x447   : > { %v1792_v43 = vpack.c.bf16 %v1783_v37, %v1782_v33  ;;  %v1784_v32 = vmul.f32 %v3666_v51, %v4340_v45  ;;  %3404 = vmatpush3.bf16.msra.mxu1 %v3557_v42  ;;  %v3560_v45 = vld [vmem:[%s4067_s4 + $0x20] sm:$0xff]  }
 0x448   : > { %v3668_v53 = vpop.eup %3667  ;;  %3405 = vmatprep.subr.bf16.mxu1 %v3558_v39 }
 0x449   : > { %3399 = vmatprep.mubr.msk.bf16.mxu0 %vm1609_vm3, %v1792_v43  ;;  %v1785_v15 = vmul.f32 %v3668_v53, %v4350_v41  ;;  %v3561_v41 = vld [vmem:[%s4067_s4 + $0x18] sm:$0xff]  }
 0x44b   : > { %v1793_v54 = vpack.c.bf16 %v1785_v15, %v1784_v32  ;;  %3406 = vmatpush3.bf16.msra.mxu1 %v3558_v39 }
 0x44c   : > { %3407 = vmatprep.subr.bf16.mxu1 %v3559_v47 }
 0x44d   : > { %3400 = vmatmul.mubr.msk.bf16.vlgmr.msra.gmra.mxu0 %vm1609_vm3, %v1793_v54 }
 0x44e   : > { %2435 = vmatprep.mubr.bf16.mxu0 %v3844_v24 }
 0x44f   : > { %3408 = vmatpush3.bf16.msra.mxu1 %v3559_v47 }
 0x450   : > { %3409 = vmatprep.subr.bf16.mxu1 %v3560_v45 }
 0x453   : > { %3410 = vmatpush3.bf16.msra.mxu1 %v3560_v45 }
 0x454   : > { %3411 = vmatprep.subr.bf16.mxu1 %v3561_v41 }
 0x457   : > { %3412 = vmatpush3.bf16.msra.mxu1 %v3561_v41 }
 0x458   : > { %3413 = vmatprep.subr.bf16.mxu1 %v3562_v48 }
 0x45b   : > { %3414 = vmatpush3.bf16.msra.mxu1 %v3562_v48 }
 0x45c   : > { %3415 = vmatprep.subr.bf16.mxu1 %v3563_v52 }
 0x45f   : > { %3416 = vmatpush3.bf16.msra.mxu1 %v3563_v52  ;;  %v3180_v52 = vld [vmem:[%s4629_s5] ss:$0 sm:$0xff] }
 0x460   : > { %3417 = vmatprep.subr.bf16.mxu1 %v3564_v55 }
 0x463   : > { %3418 = vmatpush3.bf16.msra.mxu1 %v3564_v55 }
 0x4f5   : > { %v3383_v57 = vpop.f32.mrf.mxu1 }
 0x4f6   : > { %v2074_v50 = vmul.f32 %v3383_v57, %v2063_v19 }
 0x4f7   : > { %v1838_v0 = vpop.f32.mrf.mxu1 }
 0x4f8   : > { %v2072_v9 = vmul.f32 %v2055_v4, %v1838_v0 }
 0x4f9   : > { %v3384_v2 = vpop.f32.mrf.mxu1 }
 0x4fa   : > { %v2075_v35 = vmul.f32 %v3384_v2, %v2067_v25 }
 0x4fb   : > { %v1841_v10 = vpop.f32.mrf.mxu1 }
 0x4fc   : > { %v2073_v16 = vmul.f32 %v2059_v1, %v1841_v10  ;;  %v3686_v10 = vld [vmem:[#allocation2] sm:$0xff] }
 0x4fe   : > { %v2088_v59 = vadd.f32 %v2073_v16, %v2072_v9  ;;  %v3688_v16 = vld [vmem:[#allocation2 + $0x8] sm:$0xff]  ;;  %v3567_v9 = vld [vmem:[%s4099_s13 + $0x74] ss:$8 sps:$4 sm:$0xff]  }
 0x4ff   : > { %2403 = vmatprep.subr.bf16.mxu0 %v3567_v9 }
 0x500   : > { %v2089_v17 = vadd.f32 %v2088_v59, %v2074_v50 }
 0x502   : > { %v3389_v14 = vpop.f32.mrf.mxu0  ;;  %v2090_v12 = vadd.f32 %v2089_v17, %v2075_v35 }
 0x503   : > { %v2078_v31 = vmul.f32 %v3389_v14, %v2063_v19 }
 0x504   : > { %v1896_v18 = vpop.f32.mrf.mxu0 }
 0x505   : > { %v2076_v26 = vmul.f32 %v2055_v4, %v1896_v18 }
 0x506   : > { %v3390_v22 = vpop.f32.mrf.mxu0  ;;  %v3395_v61 = vpop.f32.mrf.mxu1 }
 0x507   : > { %v2079_v38 = vmul.f32 %v3390_v22, %v2067_v25  ;;  %v2082_v37 = vmul.f32 %v3395_v61, %v2063_v19 }
 0x508   : > { %v1899_v7 = vpop.f32.mrf.mxu0  ;;  %v1954_v23 = vpop.f32.mrf.mxu1 }
 0x509   : > { %v2077_v27 = vmul.f32 %v2059_v1, %v1899_v7  ;;  %v2080_v29 = vmul.f32 %v2055_v4, %v1954_v23 }
 0x50a   : > { %v3396_v28 = vpop.f32.mrf.mxu1 }
 0x50b   : > { %v2091_v8 = vadd.f32 %v2077_v27, %v2076_v26  ;;  %v2083_v54 = vmul.f32 %v3396_v28, %v2067_v25 }
 0x50c   : > { %v1957_v30 = vpop.f32.mrf.mxu1 }
 0x50d   : > { %v2092_v20 = vadd.f32 %v2091_v8, %v2078_v31  ;;  %v3401_v34 = vpop.f32.mrf.mxu0  ;;  %v2081_v44 = vmul.f32 %v2059_v1, %v1957_v30 }
 0x50e   : > { %v2086_v32 = vmul.f32 %v3401_v34, %v2063_v19  ;;  %v3565_v19 = vld [vmem:[%s4099_s13 + $0x70] ss:$8 sps:$4 sm:$0xff]   ;;  %v3573_v34 = vld [vmem:[%s4099_s13 + $0x54] ss:$8 sps:$4 sm:$0xff]  }
 0x50f   : > { %v2012_v36 = vpop.f32.mrf.mxu0  ;;  %v2093_v46 = vadd.f32 %v2092_v20, %v2079_v38  ;;  %v2094_v49 = vadd.f32 %v2081_v44, %v2080_v29  ;;  %2404 = vmatpush1.bf16.msra.mxu0 %v3565_v19  ;;  %v3570_v38 = vld [vmem:[%s4099_s13 + $0x64] ss:$8 sps:$4 sm:$0xff]   ;;  %v3568_v20 = vld [vmem:[%s4099_s13 + $0x60] ss:$8 sps:$4 sm:$0xff]   ;;  %v3571_v44 = vld [vmem:[%s4099_s13 + $0x50] ss:$8 sps:$4 sm:$0xff]  }
 0x510   : > { %v2084_v51 = vmul.f32 %v2055_v4, %v2012_v36  ;;  %v3687_v4 = vld [vmem:[#allocation2 + $0x18] sm:$0xff]  ;;  %2405 = vmatprep.subr.bf16.mxu0 %v3570_v38  ;;  %v3576_v36 = vld [vmem:[%s4099_s13 + $0x44] ss:$8 sps:$4 sm:$0xff]  }
 0x511   : > { %v3402_v21 = vpop.f32.mrf.mxu0  ;;  %v2100_v40 = vpack.c.bf16 %v2093_v46, %v2090_v12  ;;  %v2095_v53 = vadd.f32 %v2094_v49, %v2082_v37  ;;  %v3574_v12 = vld [vmem:[%s4099_s13 + $0x40] ss:$8 sps:$4 sm:$0xff]   ;;  %v3579_v46 = vld [vmem:[%s4099_s13 + $0x34] ss:$8 sps:$4 sm:$0xff]   ;;  %v3577_v29 = vld [vmem:[%s4099_s13 + $0x30] ss:$8 sps:$4 sm:$0xff]  }
 0x512   : > { %v2087_v42 = vmul.f32 %v3402_v21, %v2067_v25  ;;  %v3582_v21 = vld [vmem:[%s4099_s13 + $0x24] ss:$8 sps:$4 sm:$0xff]   ;;  %v3585_v49 = vld [vmem:[%s4099_s13 + $0x14] ss:$8 sps:$4 sm:$0xff]  }
 0x513   : > { %v2015_v33 = vpop.f32.mrf.mxu0  ;;  %3419 = vmatprep.mubr.bf16.mxu1 %v2100_v40  ;;  %v2096_v47 = vadd.f32 %v2095_v53, %v2083_v54  ;;  %2406 = vmatpush1.bf16.msra.mxu0 %v3568_v20  ;;  %v3580_v40 = vld [vmem:[%s4099_s13 + $0x20] ss:$8 sps:$4 sm:$0xff]   ;;  %v3588_v37 = vld [vmem:[%s4099_s13 + $0x4] ss:$8 sps:$4 sm:$0xff]   ;;  %v3590_v53 = vld [vmem:[%s4119_s28 + $0x38] sm:$0xff]  }
 0x514   : > { %v2085_v43 = vmul.f32 %v2059_v1, %v2015_v33  ;;  %2407 = vmatprep.subr.bf16.mxu0 %v3573_v34  ;;  %v3583_v33 = vld [vmem:[%s4099_s13 + $0x10] ss:$8 sps:$4 sm:$0xff]   ;;  %v3593_v54 = vld [vmem:[%s4119_s28 + $0x68] sm:$0xff]   ;;  %v3603_v20 = vld [vmem:[%s4119_s28 + $0x40] sm:$0xff]  }
 0x515   : > { %v3602_v38 = vld [vmem:[%s4119_s28 + $0x8] sm:$0xff]   ;;  %v3604_v34 = vld [vmem:[%s4119_s28] sm:$0xff]  }
 0x516   : > { %v2097_v15 = vadd.f32 %v2085_v43, %v2084_v51  ;;  %v3586_v51 = vld [vmem:[%s4099_s13] ss:$8 sps:$4 sm:$0xff]   ;;  %v3589_v43 = vld [vmem:[%s4119_s28 + $0x78] sm:$0xff]  }
 0x517   : > { %2408 = vmatpush1.bf16.msra.mxu0 %v3571_v44  ;;  %3292 = vmatprep.subr.bf16.mxu1 %v3589_v43 }
 0x518   : > { %v2098_v39 = vadd.f32 %v2097_v15, %v2086_v32  ;;  %2409 = vmatprep.subr.bf16.mxu0 %v3576_v36  ;;  %v3591_v32 = vld [vmem:[%s4119_s28 + $0x70] sm:$0xff]  }
 0x519   : > { %v3592_v15 = vld [vmem:[%s4119_s28 + $0x30] sm:$0xff]  }
 0x51a   : > { %v2099_v45 = vadd.f32 %v2098_v39, %v2087_v42  ;;  %v3594_v42 = vld [vmem:[%s4119_s28 + $0x28] sm:$0xff]   ;;  %v3595_v39 = vld [vmem:[%s4119_s28 + $0x60] sm:$0xff]  }
 0x51b   : > { %2410 = vmatpush1.bf16.msra.mxu0 %v3574_v12 }
 0x51c   : > { %v2101_v41 = vpack.c.bf16 %v2099_v45, %v2096_v47  ;;  %2411 = vmatprep.subr.bf16.mxu0 %v3579_v46  ;;  %v3596_v47 = vld [vmem:[%s4119_s28 + $0x20] sm:$0xff]   ;;  %v3597_v45 = vld [vmem:[%s4119_s28 + $0x58] sm:$0xff]  }
 0x51e   : > { %3420 = vmatmul.mubr.bf16.vlgmr.msra.gmra.mxu1 %v2101_v41  ;;  %v3598_v41 = vld [vmem:[%s4119_s28 + $0x18] sm:$0xff]  }
 0x51f   : > { %2412 = vmatpush1.bf16.msra.mxu0 %v3577_v29  ;;  %3293 = vmatpush3.bf16.msra.mxu1 %v3590_v53 }
 0x520   : > { %2413 = vmatprep.subr.bf16.mxu0 %v3582_v21  ;;  %3294 = vmatprep.subr.bf16.mxu1 %v3591_v32 }
 0x523   : > { %2414 = vmatpush1.bf16.msra.mxu0 %v3580_v40  ;;  %3295 = vmatpush3.bf16.msra.mxu1 %v3592_v15 }
 0x524   : > { %2415 = vmatprep.subr.bf16.mxu0 %v3585_v49  ;;  %3296 = vmatprep.subr.bf16.mxu1 %v3593_v54 }
 0x527   : > { %2416 = vmatpush1.bf16.msra.mxu0 %v3583_v33  ;;  %3297 = vmatpush3.bf16.msra.mxu1 %v3594_v42 }
 0x528   : > { %2417 = vmatprep.subr.bf16.mxu0 %v3588_v37  ;;  %3298 = vmatprep.subr.bf16.mxu1 %v3595_v39 }
 0x52b   : > { %2418 = vmatpush1.bf16.msra.mxu0 %v3586_v51  ;;  %3299 = vmatpush3.bf16.msra.mxu1 %v3596_v47 }
 0x52c   : > { %3300 = vmatprep.subr.bf16.mxu1 %v3597_v45 }
 0x52f   : > { %3301 = vmatpush3.bf16.msra.mxu1 %v3598_v41 }
 0x5de   : > { %v3421_v48 = vpop.f32.mrf.mxu1 }
 0x5df   : > { %v2216_v0 = vadd.f32 %v3421_v48, %v3180_v52 }
 0x5e0   : > { %v2207_v55 = vpop.f32.mrf.mxu1 }
 0x5e1   : > { %v2208_v57 = vadd.f32 %v3180_v52, %v2207_v55  ;;  %v2224_v14 = vadd.f32 %v3687_v4, %v2216_v0 }
 0x5e2   : > { %v3422_v63 = vpop.f32.mrf.mxu1 }
 0x5e3   : > { %v2222_v2 = vadd.f32 %v3685_v62, %v2208_v57  ;;  %v2219_v1 = vadd.f32 %v3422_v63, %v3180_v52 }
 0x5e4   : > { %v2210_v5 = vpop.f32.mrf.mxu1 }
 0x5e5   : > { %v2211_v6 = vadd.f32 %v3180_v52, %v2210_v5  ;;  %2228 = vadd.xlane.f32.xlu0 %v2222_v2  ;;  %v2225_v18 = vadd.f32 %v3688_v16, %v2219_v1 }
 0x5e7   : > { %v2223_v13 = vadd.f32 %v3686_v10, %v2211_v6 }
 0x5e9   : > { %2230 = vadd.xlane.f32.xlu1 %v2223_v13  ;;  %2232 = vadd.xlane.f32.xlu0 %v2224_v14 }
 0x5ed   : > { %2234 = vadd.xlane.f32.xlu1 %v2225_v18 }
 0x66e   : > { %v2229_v58 = vpop.xlane.xlu0 %2228 }
 0x66f   : > { %v2237_v22 = vmul.f32 0.0078125, %v2229_v58  ;;  %v3190_v58 = vld [vmem:[%s4631_s25] ss:$0 sm:$0xff] }
 0x671   : > { %v4404_v61 = vsub.f32 %v2222_v2, %v2237_v22 }
 0x672   : > { %v2231_v59 = vpop.xlane.xlu1 %2230  ;;  %v2233_v7 = vpop.xlane.xlu0 %2232 }
 0x673   : > { %v2238_v23 = vmul.f32 0.0078125, %v2231_v59  ;;  %v2239_v50 = vmul.f32 0.0078125, %v2233_v7  ;;  %v2245_v25 = vmul.f32 %v4404_v61, %v4404_v61 }
 0x675   : > { %v4408_v26 = vsub.f32 %v2223_v13, %v2238_v23  ;;  %v4410_v27 = vsub.f32 %v2224_v14, %v2239_v50  ;;  %2249 = vadd.xlane.f32.xlu0 %v2245_v25  ;;  %v3189_v14 = vld [vmem:[%s4630_s30] ss:$0 sm:$0xff] }
 0x676   : > { %v2235_v28 = vpop.xlane.xlu1 %2234 }
 0x677   : > { %v2240_v17 = vmul.f32 0.0078125, %v2235_v28  ;;  %v2246_v31 = vmul.f32 %v4408_v26, %v4408_v26  ;;  %v2247_v8 = vmul.f32 %v4410_v27, %v4410_v27 }
 0x679   : > { %v4416_v30 = vsub.f32 %v2225_v18, %v2240_v17  ;;  %2251 = vadd.xlane.f32.xlu1 %v2246_v31  ;;  %2253 = vadd.xlane.f32.xlu0 %v2247_v8  ;;  %v3599_v8 = vld [vmem:[%s4119_s28 + $0x50] sm:$0xff]  }
 0x67a   : > { %3302 = vmatprep.subr.bf16.mxu1 %v3599_v8 }
 0x67b   : > { %v2248_v35 = vmul.f32 %v4416_v30, %v4416_v30 }
 0x67d   : > { %2255 = vadd.xlane.f32.xlu1 %v2248_v35  ;;  %v3601_v35 = vld [vmem:[%s4119_s28 + $0x48] sm:$0xff]  }
 0x6fe   : > { %v2250_v48 = vpop.xlane.xlu0 %2249 }
 0x6ff   : > { %v2257_v52 = vmul.f32 0.0078125, %v2250_v48 }
 0x701   : > { %v2261_v55 = vadd.f32 1e-05, %v2257_v52 }
 0x702   : > { %v2252_v57 = vpop.xlane.xlu1 %2251  ;;  %v2254_v63 = vpop.xlane.xlu0 %2253 }
 0x703   : > { %3669 = vrsqrt.f32 %v2261_v55  ;;  %v2258_v0 = vmul.f32 0.0078125, %v2252_v57  ;;  %v2259_v62 = vmul.f32 0.0078125, %v2254_v63 }
 0x705   : > { %v2262_v2 = vadd.f32 1e-05, %v2258_v0  ;;  %v2263_v5 = vadd.f32 1e-05, %v2259_v62 }
 0x706   : > { %v2256_v6 = vpop.xlane.xlu1 %2255 }
 0x707   : > { %3671 = vrsqrt.f32 %v2262_v2  ;;  %v2260_v1 = vmul.f32 0.0078125, %v2256_v6  ;;  %v3207_v2 = vld [vmem:[%s859_s29] ss:$0 sm:$0xff] }
 0x708   : > { %3673 = vrsqrt.f32 %v2263_v5 }
 0x709   : > { %v2264_v10 = vadd.f32 1e-05, %v2260_v1 }
 0x70b   : > { %3675 = vrsqrt.f32 %v2264_v10 }
 0x710   : > { %v3670_v13 = vpop.eup %3669 }
 0x711   : > { %v2269_v4 = vmul.f32 %v3670_v13, %v4404_v61 }
 0x713   : > { %v2279_v19 = vmul.f32 %v3189_v14, %v2269_v4 }
 0x714   : > { %v3672_v16 = vpop.eup %3671 }
 0x715   : > { %v2270_v18 = vmul.f32 %v3672_v16, %v4408_v26  ;;  %v3674_v9 = vpop.eup %3673  ;;  %v4456_v61 = vadd.f32 %v3190_v58, %v2279_v19 }
 0x716   : > { %v2271_v23 = vmul.f32 %v3674_v9, %v4410_v27 }
 0x717   : > { %v2280_v22 = vmul.f32 %v3189_v14, %v2270_v18 }
 0x718   : > { %v3676_v59 = vpop.eup %3675  ;;  %v2281_v28 = vmul.f32 %v3189_v14, %v2271_v23 }
 0x719   : > { %v4458_v7 = vadd.f32 %v3190_v58, %v2280_v22  ;;  %v2272_v50 = vmul.f32 %v3676_v59, %v4416_v30  ;;  %v3600_v30 = vld [vmem:[%s4119_s28 + $0x10] sm:$0xff]  }
 0x71a   : > { %v4467_v31 = vadd.f32 %v3190_v58, %v2281_v28  ;;  %3303 = vmatpush3.bf16.msra.mxu1 %v3600_v30 }
 0x71b   : > { %v2293_v25 = vpack.c.bf16 %v4458_v7, %v4456_v61  ;;  %v2282_v26 = vmul.f32 %v3189_v14, %v2272_v50  ;;  %3304 = vmatprep.subr.bf16.mxu1 %v3601_v35 }
 0x71d   : > { %2436 = vmatmul.mubr.bf16.vlgmr.msra.gmra.mxu0 %v2293_v25  ;;  %v4465_v17 = vadd.f32 %v3190_v58, %v2282_v26 }
 0x71e   : > { %2445 = vmatprep.mubr.bf16.mxu0 %v3844_v24  ;;  %3305 = vmatpush3.bf16.msra.mxu1 %v3602_v38  ;;  %v2311_v24 = vld [vmem:[%s4105_s19] sm:$0x3] }
 0x71f   : > { %v2294_v27 = vpack.c.bf16 %v4465_v17, %v4467_v31  ;;  %3306 = vmatprep.subr.bf16.mxu1 %v3603_v20  ;;  %v2320_v36 = vrot.slane %v2311_v24, %v1005_v11  ;;  %v2316_v12 = vrot.slane %v2311_v24, %v4185_v3 }
 0x722   : > { %3307 = vmatpush3.bf16.msra.mxu1 %v3604_v34 }
 0x725   : > { %2446 = vmatmul.mubr.bf16.gmra.mxu0 %v2294_v27 }
 0x7dd   : > { %v2437_v44 = vpop.f32.mrf.mxu0 }
 0x7de   : > { %v2438_v49 = vadd.f32 %v2437_v44, %v2316_v12 }
 0x7df   : > { %v2439_v46 = vpop.f32.mrf.mxu0 }
 0x7e0   : > { %v2440_v21 = vadd.f32 %v2439_v46, %v2320_v36  ;;  %v2456_v15 = vmax.f32 %v2438_v49, 0.0 }
 0x7e1   : > { %v2441_v29 = vpop.f32.mrf.mxu0 }
 0x7e2   : > { %v2442_v40 = vadd.f32 %v2441_v29, %v2316_v12  ;;  %v2457_v53 = vmax.f32 %v2440_v21, 0.0 }
 0x7e3   : > { %v2443_v33 = vpop.f32.mrf.mxu0 }
 0x7e4   : > { %v2444_v37 = vadd.f32 %v2443_v33, %v2320_v36  ;;  %v2458_v51 = vmax.f32 %v2442_v40, 0.0 }
 0x7e5   : > { %v2447_v43 = vpop.f32.mrf.mxu0 }
 0x7e6   : > { %v2459_v32 = vmax.f32 %v2444_v37, 0.0  ;;  %v2464_v39 = vpack.c.bf16 %v2458_v51, %v2456_v15  ;;  %v2448_v3 = vadd.f32 %v2447_v43, %v2316_v12 }
 0x7e7   : > { %v2449_v54 = vpop.f32.mrf.mxu0 }
 0x7e8   : > { %v2465_v42 = vpack.c.bf16 %v2459_v32, %v2457_v53  ;;  %v2450_v56 = vadd.f32 %v2449_v54, %v2320_v36  ;;  %v2460_v57 = vmax.f32 %v2448_v3, 0.0 }
 0x7e9   : > { %v2451_v47 = vpop.f32.mrf.mxu0 }
 0x7ea   : > { %v2452_v11 = vadd.f32 %v2451_v47, %v2316_v12  ;;  %2635 = vmatprep.mubr.bf16.mxu1 %v2465_v42  ;;  %v2461_v52 = vmax.f32 %v2450_v56, 0.0  ;;  %v3225_v56 = vld [vmem:[%s865_s24] ss:$0 sm:$0xff]  ;;  %s4635_s24 = sld [smem:[#allocation27_spill]] (!%p3226_p11) }
 0x7eb   : > { %v2453_v45 = vpop.f32.mrf.mxu0  ;;  %2636 = vmatmul.mubr.bf16.vlgmr.msra.gmra.mxu1 %v2464_v39  ;;  %v3224_v39 = vld [vmem:[%s862_s16] ss:$0 sm:$0xff] }
 0x7ec   : > { %v2454_v41 = vadd.f32 %v2453_v45, %v2320_v36  ;;  %v2462_v48 = vmax.f32 %v2452_v11, 0.0 }
 0x7ee   : > { %v2463_v55 = vmax.f32 %v2454_v41, 0.0  ;;  %v2466_v0 = vpack.c.bf16 %v2462_v48, %v2460_v57 }
 0x7f0   : > { %v2467_v63 = vpack.c.bf16 %v2463_v55, %v2461_v52 }
 0x7f2   : > { %2643 = vmatprep.mubr.bf16.mxu1 %v2467_v63 }
 0x7f3   : > { %2644 = vmatmul.mubr.bf16.gmra.mxu1 %v2466_v0 }
 0x8ab   : > { %v3308_v62 = vpop.f32.mrf.mxu1 }
 0x8ad   : > { %v3309_v5 = vpop.f32.mrf.mxu1 }
 0x8ae   : > { %v3310_v6 = vadd.f32 %v3309_v5, %v3308_v62 }
 0x8af   : > { %v3311_v1 = vpop.f32.mrf.mxu1 }
 0x8b0   : > { %v2638_v10 = vadd.f32 %v3310_v6, %v3207_v2 }
 0x8b1   : > { %v3312_v13 = vpop.f32.mrf.mxu1 }
 0x8b2   : > { %v3313_v4 = vadd.f32 %v3312_v13, %v3311_v1  ;;  %v2652_v14 = vadd.f32 %v2638_v10, %v4456_v61 }
 0x8b3   : > { %v3314_v16 = vpop.f32.mrf.mxu1 }
 0x8b4   : > { %v2641_v18 = vadd.f32 %v3313_v4, %v3207_v2  ;;  %2658 = vadd.xlane.f32.xlu0 %v2652_v14 }
 0x8b5   : > { %v3315_v19 = vpop.f32.mrf.mxu1 }
 0x8b6   : > { %v3316_v9 = vadd.f32 %v3315_v19, %v3314_v16  ;;  %v2653_v58 = vadd.f32 %v2641_v18, %v4458_v7 }
 0x8b7   : > { %v3317_v22 = vpop.f32.mrf.mxu1 }
 0x8b8   : > { %v2646_v59 = vadd.f32 %v3316_v9, %v3207_v2  ;;  %2660 = vadd.xlane.f32.xlu1 %v2653_v58 }
 0x8b9   : > { %v3318_v23 = vpop.f32.mrf.mxu1 }
 0x8ba   : > { %v3319_v50 = vadd.f32 %v3318_v23, %v3317_v22  ;;  %v2654_v25 = vadd.f32 %v2646_v59, %v4467_v31 }
 0x8bc   : > { %v2649_v26 = vadd.f32 %v3319_v50, %v3207_v2  ;;  %2662 = vadd.xlane.f32.xlu0 %v2654_v25 }
 0x8be   : > { %v2655_v28 = vadd.f32 %v2649_v26, %v4465_v17 }
 0x8c0   : > { %2664 = vadd.xlane.f32.xlu1 %v2655_v28 }
 0x93d   : > { %v2659_v61 = vpop.xlane.xlu0 %2658 }
 0x93e   : > { %v2666_v27 = vmul.f32 0.0078125, %v2659_v61 }
 0x940   : > { %v2670_v8 = vsub.f32 %v2652_v14, %v2666_v27 }
 0x941   : > { %v2661_v30 = vpop.xlane.xlu1 %2660 }
 0x942   : > { %v2667_v35 = vmul.f32 0.0078125, %v2661_v30  ;;  %v2674_v38 = vmul.f32 %v2670_v8, %v2670_v8 }
 0x944   : > { %v2671_v20 = vsub.f32 %v2653_v58, %v2667_v35  ;;  %2678 = vadd.xlane.f32.xlu0 %v2674_v38 }
 0x945   : > { %v2663_v7 = vpop.xlane.xlu0 %2662 }
 0x946   : > { %v2668_v34 = vmul.f32 0.0078125, %v2663_v7  ;;  %v2675_v24 = vmul.f32 %v2671_v20, %v2671_v20 }
 0x948   : > { %v2672_v44 = vsub.f32 %v2654_v25, %v2668_v34  ;;  %2680 = vadd.xlane.f32.xlu1 %v2675_v24 }
 0x949   : > { %v2665_v36 = vpop.xlane.xlu1 %2664 }
 0x94a   : > { %v2669_v31 = vmul.f32 0.0078125, %v2665_v36  ;;  %v2676_v12 = vmul.f32 %v2672_v44, %v2672_v44 }
 0x94c   : > { %v2673_v46 = vsub.f32 %v2655_v28, %v2669_v31  ;;  %2682 = vadd.xlane.f32.xlu0 %v2676_v12 }
 0x94e   : > { %v2677_v17 = vmul.f32 %v2673_v46, %v2673_v46 }
 0x950   : > { %2684 = vadd.xlane.f32.xlu1 %v2677_v17 }
 0x9cd   : > { %v2679_v29 = vpop.xlane.xlu0 %2678 }
 0x9ce   : > { %v2686_v21 = vmul.f32 0.0078125, %v2679_v29 }
 0x9d0   : > { %v2690_v40 = vadd.f32 1e-05, %v2686_v21 }
 0x9d1   : > { %v2681_v49 = vpop.xlane.xlu1 %2680 }
 0x9d2   : > { %3677 = vrsqrt.f32 %v2690_v40  ;;  %v2687_v33 = vmul.f32 0.0078125, %v2681_v49 }
 0x9d4   : > { %v2691_v37 = vadd.f32 1e-05, %v2687_v33 }
 0x9d5   : > { %v2683_v51 = vpop.xlane.xlu0 %2682 }
 0x9d6   : > { %3679 = vrsqrt.f32 %v2691_v37  ;;  %v2688_v43 = vmul.f32 0.0078125, %v2683_v51 }
 0x9d8   : > { %v2692_v53 = vadd.f32 1e-05, %v2688_v43 }
 0x9d9   : > { %v2685_v32 = vpop.xlane.xlu1 %2684 }
 0x9da   : > { %3681 = vrsqrt.f32 %v2692_v53  ;;  %v2689_v15 = vmul.f32 0.0078125, %v2685_v32 }
 0x9dc   : > { %v2693_v54 = vadd.f32 1e-05, %v2689_v15 }
 0x9de   : > { %3683 = vrsqrt.f32 %v2693_v54 }
 0x9df   : > { %v3678_v42 = vpop.eup %3677 }
 0x9e0   : > { %v2698_v47 = vmul.f32 %v3678_v42, %v2670_v8 }
 0x9e2   : > { %v2708_v11 = vmul.f32 %v3224_v39, %v2698_v47 }
 0x9e3   : > { %v3680_v3 = vpop.eup %3679 }
 0x9e4   : > { %v2718_v45 = vadd.f32 %v3225_v56, %v2708_v11  ;;  %v2699_v41 = vmul.f32 %v3680_v3, %v2671_v20 }
 0x9e6   : > { %2722 = vst [vmem:[#allocation2 + $0x10] sm:$0xff] %v2718_v45  ;;  %v2709_v48 = vmul.f32 %v3224_v39, %v2699_v41 }
 0x9e7   : > { %v3682_v52 = vpop.eup %3681 }
 0x9e8   : > { %v2719_v55 = vadd.f32 %v3225_v56, %v2709_v48  ;;  %v2700_v57 = vmul.f32 %v3682_v52, %v2672_v44 }
 0x9ea   : > { %2723 = vst [vmem:[#allocation2] sm:$0xff] %v2719_v55  ;;  %v2710_v63 = vmul.f32 %v3224_v39, %v2700_v57 }
 0x9eb   : > { %v3684_v0 = vpop.eup %3683 }
 0x9ec   : > { %v2720_v62 = vadd.f32 %v3225_v56, %v2710_v63  ;;  %v2701_v2 = vmul.f32 %v3684_v0, %v2673_v46 }
 0x9ee   : > { %2724 = vst [vmem:[#allocation2 + $0x18] sm:$0xff] %v2720_v62  ;;  %v2711_v5 = vmul.f32 %v3224_v39, %v2701_v2  ;;  %2729 = sbr.rel (%p3226_p11) target bundleno = 2784 (0xae0), region = 116 }
 0x9f0   : > { %v2721_v6 = vadd.f32 %v3225_v56, %v2711_v5 }
 0x9f2   : > { %2725 = vst [vmem:[#allocation2 + $0x8] sm:$0xff] %v2721_v6 }
 0x9f3   : > { %v3689_v1 = vld [vmem:[%s4635_s24 + $0x38] sm:$0xff]   ;;  %v3846_v10 = vmov 0.0   ;;  %v3690_v13 = vld [vmem:[%s4635_s24 + $0x30] sm:$0xff]   ;;  %vm3847_vm4 = vmmov 0   ;;  %v3691_v4 = vld [vmem:[%s4635_s24 + $0x28] sm:$0xff]   ;;  %vm2771_vm5 = vcmask 1041409  }
 0x9f4   : > { %3423 = vmatprep.subr.bf16.mxu0 %v3846_v10  ;;  %3439 = vmatprep.mubr.msk.bf16.mxu0 %vm3847_vm4, %v3846_v10  ;;  %v2730_v14 = vld [vmem:[#allocation2 + $0x10] sm:$0xff]  ;;  %v2731_v16 = vld [vmem:[#allocation2] sm:$0xff]  ;;  %v3693_v25 = vld [vmem:[%s4635_s24 + $0x18] sm:$0xff]   ;;  %vm2774_vm6 = vcmask 1042434   ;;  %vm2777_vm7 = vcmask 1043459  }
 0x9f5   : > { %3424 = vmatpush3.bf16.msra.mxu0 %v3689_v1  ;;  %v2732_v18 = vld [vmem:[#allocation2 + $0x18] sm:$0xff]  ;;  %v2734_v19 = vpack.c.bf16 %v2730_v14, %v2730_v14  ;;  %v2735_v9 = vpack.c.bf16 %v2731_v16, %v2731_v16  ;;  %v3692_v58 = vld [vmem:[%s4635_s24 + $0x20] sm:$0xff]   ;;  %v3694_v8 = vld [vmem:[%s4635_s24 + $0x10] sm:$0xff]  }
 0x9f6   : > { %3425 = vmatprep.subr.bf16.mxu0 %v3846_v10  ;;  %v2736_v59 = vpack.c.bf16 %v2732_v18, %v2732_v18  ;;  %v3695_v20 = vld [vmem:[%s4635_s24 + $0x8] sm:$0xff]   ;;  %v3696_v24 = vld [vmem:[%s4635_s24] sm:$0xff]  }
 0x9f7   : > { %v2765_v23 = vunpack.c.l.b16 %v2734_v19  ;;  %v2766_v50 = vunpack.c.l.b16 %v2735_v9  ;;  %v3227_v31 = vld [vmem:[%s4636_s3] ss:$0 sm:$0xff] }
 0x9f8   : > { %v2767_v28 = vunpack.c.l.b16 %v2736_v59 }
 0x9f9   : > { %3426 = vmatpush3.bf16.msra.mxu0 %v3690_v13  ;;  %v2733_v22 = vld [vmem:[#allocation2 + $0x8] sm:$0xff]  ;;  %v2769_v61 = vrot.slane %v2765_v23, 7  ;;  %v2770_v27 = vrot.slane %v2766_v50, 6 }
 0x9fa   : > { %3427 = vmatprep.subr.bf16.mxu0 %v3846_v10  ;;  %v2737_v26 = vpack.c.bf16 %v2733_v22, %v2733_v22  ;;  %v2773_v35 = vrot.slane %v2767_v28, 5 }
 0x9fb   : > { %v2772_v38 = vsel %vm2771_vm5, %v2770_v27, %v2769_v61 }
 0x9fc   : > { %v2768_v30 = vunpack.c.l.b16 %v2737_v26  ;;  %v2775_v34 = vsel %vm2774_vm6, %v2773_v35, %v2772_v38 }
 0x9fd   : > { %3428 = vmatpush3.bf16.msra.mxu0 %v3691_v4 }
 0x9fe   : > { %3429 = vmatprep.subr.bf16.mxu0 %v3846_v10  ;;  %v2776_v7 = vrot.slane %v2768_v30, 4 }
 0xa00   : > { %v2778_v44 = vsel %vm2777_vm7, %v2776_v7, %v2775_v34 }
 0xa01   : > { %3430 = vmatpush3.bf16.msra.mxu0 %v3692_v58  ;;  %v2779_v36 = vpack.c.b16 %v2778_v44, %v2778_v44 }
 0xa02   : > { %3431 = vmatprep.subr.bf16.mxu0 %v3846_v10 }
 0xa05   : > { %3432 = vmatpush3.bf16.msra.mxu0 %v3693_v25 }
 0xa06   : > { %3433 = vmatprep.subr.bf16.mxu0 %v3846_v10 }
 0xa09   : > { %3434 = vmatpush3.bf16.msra.mxu0 %v3694_v8 }
 0xa0a   : > { %3435 = vmatprep.subr.bf16.mxu0 %v3846_v10 }
 0xa0d   : > { %3436 = vmatpush3.bf16.msra.mxu0 %v3695_v20 }
 0xa0e   : > { %3437 = vmatprep.subr.bf16.mxu0 %v3846_v10 }
 0xa11   : > { %3438 = vmatpush3.bf16.msra.mxu0 %v3696_v24 }
 0xa14   : > { %3440 = vmatmul.mubr.bf16.vlgmr.msra.gmra.mxu0 %v2779_v36 }
 0xad4   : > { %v2863_v12 = vpop.f32.mrf.mxu0 }
 0xad5   : > { %v2864_v46 = vadd.f32 %v3227_v31, %v2863_v12 }
 0xad6   : > { %v3441_v17 = vpop.f32.mrf.mxu0 }
 0xad7   : > { %v2876_v29 = vrot.slane %v2864_v46, %v4179_v60 }
 0xad8   : > { %v2866_v21 = vpop.f32.mrf.mxu0 }
 0xad9   : > { %v2877_v40 = vcombine.high %v2876_v29, %v2876_v29  ;;  %v2884_v49 = vrot.slane %v2876_v29, %v4179_v60  ;;  %3236 = vst.sshfl [vmem:[%s4637_s17] sm:$0x1 pattern:$0x73625140] %v2876_v29 }
 0xada   : > { %v3442_v33 = vpop.f32.mrf.mxu0 }
 0xadb   : > { %v2891_v37 = vrot.slane %v2877_v40, %v4179_v60  ;;  %v2892_v51 = vcombine.high %v2884_v49, %v2884_v49  ;;  %3237 = vst.sshfl [vmem:[%s4637_s17 + $0x1] sm:$0x1 pattern:$0x73625140] %v2877_v40 }
 0xadd   : > { %v2893_v43 = vcombine.high %v2891_v37, %v2891_v37  ;;  %2900 = vst [vmem:[%s4637_s17 + $0x2] sm:$0x1] %v2892_v51 }
 0xadf   : > { %2901 = vst [vmem:[%s4637_s17 + $0x3] sm:$0x1] %v2893_v43 }
 0xae0 PF: > { %s35_s22 = sadd.s32 1, %s3835_s22   ;;  %s4638_s0 = sld [smem:[#allocation10_spill]] }
 0xae1   : > { %p32_p6 = scmp.ge.s32.totalorder %s35_s22, 4   ;;  %s4639_s30 = sld [smem:[#allocation11_spill]] }
 0xae2   : > { %s4640_s20 = sld [smem:[#allocation14_spill]] }
 0xae3   : > { %s4641_s21 = sld [smem:[#allocation12_spill]]  ;;  %34 = sbr.rel (!%p32_p6) target bundleno = 22 (0x16), region = 198 }
 0xae4   : > { %s4642_s1 = sld [smem:[#allocation13_spill]] }
 0xae8   :  { %2922 = vsyncpa [#allocation4], 1 }
 0xae9   :  { %2924 = vsyncpa [#allocation4 + $0x1], 1 }
 0xaea   :  { %2925 = vsyncpa [#allocation6], 1 }
 0xaeb   :  { %2927 = vsyncpa [#allocation6 + $0x1], 1 }

</bundles_post_ra>
